<compile_context>
chip_gen: v6e
topology: v6e:2x2x1
jax: 0.10.0
libtpu: 0.0.40
codegen_flags: <defaults>
</compile_context>

<pallas_src>
import functools

import jax
import jax.numpy as jnp
from jax.experimental import pallas as pl
from jax.experimental.pallas import tpu as pltpu

LANE = 128
SUBLANE = 8


def _use_bf16_activations() -> bool:
    """bf16 VPU/EUP exists on v6e and later; v5e must stay f32."""
    try:
        kind = jax.devices()[0].device_kind.lower()
    except Exception:
        return False
    return any(tag in kind for tag in ("v6", "v7"))


def make_lstm_kernel(num_layers: int, hidden_size: int, seq_len: int,
                     batch_pad: int, use_bf16_act: bool):
    """Builds a Pallas kernel computing the full LSTM unroll + final Linear."""
    H = hidden_size
    G = 4 * H
    T = seq_len
    Bp = batch_pad

    def kernel(*refs):
        x_ref = refs[0]                                    # (T*Bp, I)  f32
        w0_ih_ref, w0_hh_ref, b0_ref = refs[1], refs[2], refs[3]
        idx = 4
        upper_refs = []                                    # per layer>=1: (W_ih, W_hh, b)
        for _ in range(num_layers - 1):
            upper_refs.append((refs[idx], refs[idx + 1], refs[idx + 2]))
            idx += 3
        fcw_ref, fcb_ref = refs[idx], refs[idx + 1]
        out_ref = refs[idx + 2]                            # (Bp, Op) f32
        xp_ref = refs[idx + 3]                             # (T*Bp, 4H) bf16 scratch

        # ---- Hoisted layer-0 input projection (one big MXU matmul, bias folded).
        xp_ref[...] = (
            jnp.dot(x_ref[...].astype(jnp.bfloat16), w0_ih_ref[...],
                    preferred_element_type=jnp.float32)
            + b0_ref[...]).astype(jnp.bfloat16)

        # ---- Hoist weight loads, bias broadcasts and the gate lane-mask
        #      (JAX does not CSE broadcast_in_dim inside the loop).
        w0_hh = w0_hh_ref[...]                             # (H, 4H) bf16
        upper_ws = [(wih_ref[...], whh_ref[...],
                     jnp.broadcast_to(b_ref[...], (Bp, G)))
                    for (wih_ref, whh_ref, b_ref) in upper_refs]
        fc_w = fcw_ref[...]
        fc_b = fcb_ref[...]
        lane = jax.lax.broadcasted_iota(jnp.int32, (Bp, G), 1)
        tanh_mask = (lane >= 2 * H) & (lane < 3 * H)       # PyTorch gate order i,f,g,o

        act_dtype = jnp.bfloat16 if use_bf16_act else jnp.float32

        def gate_update(gates, c):
            # Single EUP pass over the full (Bp, 4H) vreg:
            #   tanh(x) = 2*sigmoid(2x) - 1, so pre-scale tanh lanes by 2,
            #   run ONE sigmoid, then post-fix those lanes with 2s - 1.
            pre = jnp.where(tanh_mask, gates * 2.0, gates)
            s = jax.nn.sigmoid(pre.astype(act_dtype)).astype(jnp.float32)
            act = jnp.where(tanh_mask, 2.0 * s - 1.0, s)
            i = act[:, 0 * H:1 * H]
            f = act[:, 1 * H:2 * H]
            g = act[:, 2 * H:3 * H]
            o = act[:, 3 * H:4 * H]
            c_new = f * c + i * g                          # state math stays f32
            t = jnp.tanh(c_new.astype(act_dtype)).astype(jnp.float32)
            h_new = o * t
            return h_new, c_new

        init = tuple(jnp.zeros((Bp, H), jnp.float32) for _ in range(2 * num_layers))

        def step(t, carry):
            row = pl.multiple_of(t * Bp, Bp)
            xp_t = xp_ref[pl.ds(row, Bp), :]               # (Bp, 4H) bf16, bias folded
            new_carry = []
            # Layer 0: only the recurrent matmul sits on the serial chain.
            h, c = carry[0], carry[1]
            gates = xp_t.astype(jnp.float32) + jnp.dot(
                h.astype(jnp.bfloat16), w0_hh, preferred_element_type=jnp.float32)
            h, c = gate_update(gates, c)
            new_carry += [h, c]
            inp = h
            # Upper layers: two small MXU pushes (no per-step lane concat).
            for l in range(1, num_layers):
                h, c = carry[2 * l], carry[2 * l + 1]
                w_ih, w_hh, b_bcast = upper_ws[l - 1]
                gates = (jnp.dot(inp.astype(jnp.bfloat16), w_ih,
                                 preferred_element_type=jnp.float32)
                         + jnp.dot(h.astype(jnp.bfloat16), w_hh,
                                   preferred_element_type=jnp.float32)
                         + b_bcast)
                h, c = gate_update(gates, c)
                new_carry += [h, c]
                inp = h
            # TODO(synk): PyTorch applies dropout(p=0.2) between layers only in
            # train mode; inference semantics (identity) implemented here.
            return tuple(new_carry)

        carry = jax.lax.fori_loop(0, T, step, init, unroll=True)
        h_last = carry[2 * (num_layers - 1)]               # top layer, last time step

        # fc(out[:, -1, :]) into a lane-dense (Bp, 128) slab.
        out_ref[...] = (jnp.dot(h_last.astype(jnp.bfloat16), fc_w,
                                preferred_element_type=jnp.float32)
                        + fc_b)

    return kernel


def init_params(key, input_size, hidden_size, num_layers, output_size):
    """Deterministic init matching PyTorch's parameter shapes (uniform +-1/sqrt(H))."""
    k = 1.0 / jnp.sqrt(jnp.float32(hidden_size))
    params = {"layers": []}
    for l in range(num_layers):
        in_sz = input_size if l == 0 else hidden_size
        key, k1, k2, k3, k4 = jax.random.split(key, 5)
        w_ih = jax.random.uniform(k1, (4 * hidden_size, in_sz), jnp.float32, -k, k)
        w_hh = jax.random.uniform(k2, (4 * hidden_size, hidden_size), jnp.float32, -k, k)
        b_ih = jax.random.uniform(k3, (4 * hidden_size,), jnp.float32, -k, k)
        b_hh = jax.random.uniform(k4, (4 * hidden_size,), jnp.float32, -k, k)
        params["layers"].append((w_ih, w_hh, b_ih, b_hh))
    key, k1, k2 = jax.random.split(key, 3)
    params["fc_w"] = jax.random.uniform(k1, (output_size, hidden_size), jnp.float32, -k, k)
    params["fc_b"] = jax.random.uniform(k2, (output_size,), jnp.float32, -k, k)
    return params


def prepare_params(params, hidden_size, output_size):
    """One-time packing into kernel layout: transposes, bias sums, bf16 casts
    and output lane padding — done at init, not per forward call."""
    H = hidden_size
    Op = ((output_size + LANE - 1) // LANE) * LANE
    w_ih0, w_hh0, b_ih0, b_hh0 = params["layers"][0]
    packed = {
        "w0_ih": jnp.transpose(w_ih0).astype(jnp.bfloat16),          # (I, 4H)
        "w0_hh": jnp.transpose(w_hh0).astype(jnp.bfloat16),          # (H, 4H)
        "b0": (b_ih0 + b_hh0).reshape(1, 4 * H).astype(jnp.float32),
        "upper": [],
    }
    for (w_ih, w_hh, b_ih, b_hh) in params["layers"][1:]:
        packed["upper"].append(
            (jnp.transpose(w_ih).astype(jnp.bfloat16),               # (H, 4H)
             jnp.transpose(w_hh).astype(jnp.bfloat16),               # (H, 4H)
             (b_ih + b_hh).reshape(1, 4 * H).astype(jnp.float32)))
    fc_w = jnp.pad(jnp.transpose(params["fc_w"]), ((0, 0), (0, Op - output_size)))
    fc_b = jnp.pad(params["fc_b"], (0, Op - output_size)).reshape(1, Op)
    packed["fc_w"] = fc_w.astype(jnp.bfloat16)                        # (H, Op)
    packed["fc_b"] = fc_b.astype(jnp.float32)                         # (1, Op)
    return packed


def lstm_model_forward(x, packed, hidden_size, num_layers, output_size,
                       use_bf16_act=False):
    """x: (B, T, input_size) float32 -> (B, output_size) float32."""
    B, T, I = x.shape
    Bp = ((B + SUBLANE - 1) // SUBLANE) * SUBLANE
    Op = packed["fc_w"].shape[1]

    # Pad batch to a full sublane tile; flatten time-major (row t*Bp + b).
    x_p = jnp.zeros((T, Bp, I), x.dtype).at[:, :B, :].set(jnp.transpose(x, (1, 0, 2)))
    x_flat = x_p.reshape(T * Bp, I)

    inputs = [x_flat, packed["w0_ih"], packed["w0_hh"], packed["b0"]]
    for w_ih, w_hh, b in packed["upper"]:
        inputs += [w_ih, w_hh, b]
    inputs += [packed["fc_w"], packed["fc_b"]]

    kernel = make_lstm_kernel(num_layers, hidden_size, T, Bp, use_bf16_act)
    vmem = pl.BlockSpec(memory_space=pltpu.MemorySpace.VMEM)
    out_padded = pl.pallas_call(
        kernel,
        out_shape=jax.ShapeDtypeStruct((Bp, Op), jnp.float32),
        in_specs=[vmem] * len(inputs),
        out_specs=vmem,
        scratch_shapes=[pltpu.VMEM((T * Bp, 4 * hidden_size), jnp.bfloat16)],
        compiler_params=pltpu.CompilerParams(
            # Explicit scoped-VMEM budget (v5e default is only 16 MiB); toy
            # sizes fit with huge margin, and 32 MiB is within every chip's
            # physical VMEM (v7x has 64 MiB).
            vmem_limit_bytes=32 * 1024 * 1024),
    )(*inputs)
    return out_padded[:B, :output_size]


def reference_forward(x, params, hidden_size, num_layers):
    """Pure-JAX f32 reference (same math as the PyTorch module in eval mode)."""
    B, T, I = x.shape
    hs = [jnp.zeros((B, hidden_size), jnp.float32) for _ in range(num_layers)]
    cs = [jnp.zeros((B, hidden_size), jnp.float32) for _ in range(num_layers)]
    H = hidden_size
    for t in range(T):
        inp = x[:, t, :]
        for l, (w_ih, w_hh, b_ih, b_hh) in enumerate(params["layers"]):
            gates = inp @ w_ih.T + hs[l] @ w_hh.T + b_ih + b_hh
            i = jax.nn.sigmoid(gates[:, 0 * H:1 * H])
            f = jax.nn.sigmoid(gates[:, 1 * H:2 * H])
            g = jnp.tanh(gates[:, 2 * H:3 * H])
            o = jax.nn.sigmoid(gates[:, 3 * H:4 * H])
            cs[l] = f * cs[l] + i * g
            hs[l] = o * jnp.tanh(cs[l])
            inp = hs[l]
    return hs[-1] @ params["fc_w"].T + params["fc_b"]


if __name__ == "__main__":
    # Small shapes consistent with the module's forward: batch=2, seq=8,
    # input_size=4, hidden_size=32, num_layers=2, output_size=3.
    B, T, input_size, hidden_size, num_layers, output_size = 2, 8, 4, 32, 2, 3

    key = jax.random.PRNGKey(0)
    key_x, key_p = jax.random.split(key)
    x = jax.random.normal(key_x, (B, T, input_size), jnp.float32)
    params = init_params(key_p, input_size, hidden_size, num_layers, output_size)
    packed = prepare_params(params, hidden_size, output_size)

    use_bf16_act = _use_bf16_activations()   # v6e/v7x only; f32 on v5e

    fwd = jax.jit(functools.partial(lstm_model_forward,
                                    hidden_size=hidden_size,
                                    num_layers=num_layers,
                                    output_size=output_size,
                                    use_bf16_act=use_bf16_act))

    out = jax.block_until_ready(fwd(x, packed))
    ref = reference_forward(x, params, hidden_size, num_layers)

    assert out.shape == (B, output_size)
    # Matmul operands (and optionally the transcendentals) are bf16 with f32
    # accumulation, so tolerance is looser than pure-f32; observed error is
    # O(1e-3) at these sizes.
    assert jnp.allclose(out, ref, atol=2e-2, rtol=2e-2), (out, ref)
    print("KERNEL_OK")
</pallas_src>

<mosaic_0001>
module attributes {stable_mosaic.version = 11 : i64} {
  func.func @kernel(%arg0: memref<64x4xf32, #tpu.memory_space<vmem>>, %arg1: memref<4x128xbf16, #tpu.memory_space<vmem>>, %arg2: memref<32x128xbf16, #tpu.memory_space<vmem>>, %arg3: memref<1x128xf32, #tpu.memory_space<vmem>>, %arg4: memref<32x128xbf16, #tpu.memory_space<vmem>>, %arg5: memref<32x128xbf16, #tpu.memory_space<vmem>>, %arg6: memref<1x128xf32, #tpu.memory_space<vmem>>, %arg7: memref<32x128xbf16, #tpu.memory_space<vmem>>, %arg8: memref<1x128xf32, #tpu.memory_space<vmem>>, %arg9: memref<8x128xf32, #tpu.memory_space<vmem>>, %arg10: memref<64x128xbf16, #tpu.memory_space<vmem>>) attributes {dimension_semantics = [], scalar_prefetch = 0 : i64, scratch_operands = 1 : i64, tpu.core_type = #tpu.core_type<tc>} {
    %c0 = arith.constant 0 : index
    %c0_0 = arith.constant 0 : index
    %0 = vector.load %arg0[%c0, %c0_0] : memref<64x4xf32, #tpu.memory_space<vmem>>, vector<64x4xf32>
    %1 = arith.truncf %0 : vector<64x4xf32> to vector<64x4xbf16>
    %c0_1 = arith.constant 0 : index
    %c0_2 = arith.constant 0 : index
    %2 = vector.load %arg1[%c0_1, %c0_2] : memref<4x128xbf16, #tpu.memory_space<vmem>>, vector<4x128xbf16>
    %cst = arith.constant dense<0.000000e+00> : vector<64x128xf32>
    %3 = tpu.matmul %1, %2, %cst {dimension_numbers = #tpu.dot_dimension_numbers<[1], [0], [0], [1], [0, 0, 1, 1], [], []>} : vector<64x4xbf16>, vector<4x128xbf16>, vector<64x128xf32> -> vector<64x128xf32>
    %c0_3 = arith.constant 0 : index
    %c0_4 = arith.constant 0 : index
    %4 = vector.load %arg3[%c0_3, %c0_4] : memref<1x128xf32, #tpu.memory_space<vmem>>, vector<1x128xf32>
    %5 = vector.broadcast %4 : vector<1x128xf32> to vector<64x128xf32>
    %6 = arith.addf %3, %5 : vector<64x128xf32>
    %7 = arith.truncf %6 : vector<64x128xf32> to vector<64x128xbf16>
    %c0_5 = arith.constant 0 : index
    %c0_6 = arith.constant 0 : index
    %8 = vector.load %arg10[%c0_5, %c0_6] : memref<64x128xbf16, #tpu.memory_space<vmem>>, vector<64x128xbf16>
    tpu.vector_store %arg10[%c0_5, %c0_6], %7 {strides = array<i32>} : memref<64x128xbf16, #tpu.memory_space<vmem>>, vector<64x128xbf16>,
    %c0_7 = arith.constant 0 : index
    %c0_8 = arith.constant 0 : index
    %9 = vector.load %arg2[%c0_7, %c0_8] : memref<32x128xbf16, #tpu.memory_space<vmem>>, vector<32x128xbf16>
    %c0_9 = arith.constant 0 : index
    %c0_10 = arith.constant 0 : index
    %10 = vector.load %arg4[%c0_9, %c0_10] : memref<32x128xbf16, #tpu.memory_space<vmem>>, vector<32x128xbf16>
    %c0_11 = arith.constant 0 : index
    %c0_12 = arith.constant 0 : index
    %11 = vector.load %arg5[%c0_11, %c0_12] : memref<32x128xbf16, #tpu.memory_space<vmem>>, vector<32x128xbf16>
    %c0_13 = arith.constant 0 : index
    %c0_14 = arith.constant 0 : index
    %12 = vector.load %arg6[%c0_13, %c0_14] : memref<1x128xf32, #tpu.memory_space<vmem>>, vector<1x128xf32>
    %13 = vector.shape_cast %12 : vector<1x128xf32> to vector<1x128xf32>
    %14 = vector.broadcast %13 : vector<1x128xf32> to vector<8x128xf32>
    %c0_15 = arith.constant 0 : index
    %c0_16 = arith.constant 0 : index
    %15 = vector.load %arg7[%c0_15, %c0_16] : memref<32x128xbf16, #tpu.memory_space<vmem>>, vector<32x128xbf16>
    %c0_17 = arith.constant 0 : index
    %c0_18 = arith.constant 0 : index
    %16 = vector.load %arg8[%c0_17, %c0_18] : memref<1x128xf32, #tpu.memory_space<vmem>>, vector<1x128xf32>
    %17 = tpu.iota {dimensions = array<i32: 1>} : vector<8x128xi32>
    %c64_i32 = arith.constant 64 : i32
    %18 = vector.broadcast %c64_i32 : i32 to vector<8x128xi32>
    %19 = arith.cmpi sge, %17, %18 : vector<8x128xi32>
    %c96_i32 = arith.constant 96 : i32
    %20 = vector.broadcast %c96_i32 : i32 to vector<8x128xi32>
    %21 = arith.cmpi slt, %17, %20 : vector<8x128xi32>
    %22 = arith.andi %19, %21 : vector<8x128xi1>
    %cst_19 = arith.constant 0.000000e+00 : f32
    %23 = vector.broadcast %cst_19 : f32 to vector<8x32xf32>
    %cst_20 = arith.constant 0.000000e+00 : f32
    %24 = vector.broadcast %cst_20 : f32 to vector<8x32xf32>
    %cst_21 = arith.constant 0.000000e+00 : f32
    %25 = vector.broadcast %cst_21 : f32 to vector<8x32xf32>
    %cst_22 = arith.constant 0.000000e+00 : f32
    %26 = vector.broadcast %cst_22 : f32 to vector<8x32xf32>
    %c0_i32 = arith.constant 0 : i32
    %c8_i32 = arith.constant 8 : i32
    %27 = arith.muli %c0_i32, %c8_i32 : i32
    %28 = tpu.assume_multiple %27, 8 : i32
    %29 = arith.index_cast %28 : i32 to index
    %c0_23 = arith.constant 0 : index
    %30 = vector.load %arg10[%29, %c0_23] : memref<64x128xbf16, #tpu.memory_space<vmem>>, vector<8x128xbf16>
    %31 = arith.extf %30 : vector<8x128xbf16> to vector<8x128xf32>
    %32 = arith.truncf %23 : vector<8x32xf32> to vector<8x32xbf16>
    %cst_24 = arith.constant dense<0.000000e+00> : vector<8x128xf32>
    %33 = tpu.matmul %32, %9, %cst_24 {dimension_numbers = #tpu.dot_dimension_numbers<[1], [0], [0], [1], [0, 0, 1, 1], [], []>} : vector<8x32xbf16>, vector<32x128xbf16>, vector<8x128xf32> -> vector<8x128xf32>
    %34 = arith.addf %31, %33 : vector<8x128xf32>
    %cst_25 = arith.constant 2.000000e+00 : f32
    %35 = vector.broadcast %cst_25 : f32 to vector<8x128xf32>
    %36 = arith.mulf %34, %35 : vector<8x128xf32>
    %37 = arith.select %22, %36, %34 : vector<8x128xi1>, vector<8x128xf32>
    %38 = arith.negf %37 : vector<8x128xf32>
    %39 = math.exp %38 : vector<8x128xf32>
    %cst_26 = arith.constant 1.000000e+00 : f32
    %40 = vector.broadcast %cst_26 : f32 to vector<8x128xf32>
    %41 = arith.addf %40, %39 : vector<8x128xf32>
    %42 = arith.divf %40, %41 : vector<8x128xf32>
    %cst_27 = arith.constant 2.000000e+00 : f32
    %43 = vector.broadcast %cst_27 : f32 to vector<8x128xf32>
    %44 = arith.mulf %43, %42 : vector<8x128xf32>
    %cst_28 = arith.constant 1.000000e+00 : f32
    %45 = vector.broadcast %cst_28 : f32 to vector<8x128xf32>
    %46 = arith.subf %44, %45 : vector<8x128xf32>
    %47 = arith.select %22, %46, %42 : vector<8x128xi1>, vector<8x128xf32>
    %48 = vector.extract_strided_slice %47 {offsets = [0, 0], sizes = [8, 32], strides = [1, 1]} : vector<8x128xf32> to vector<8x32xf32>
    %49 = vector.extract_strided_slice %47 {offsets = [0, 32], sizes = [8, 32], strides = [1, 1]} : vector<8x128xf32> to vector<8x32xf32>
    %50 = vector.extract_strided_slice %47 {offsets = [0, 64], sizes = [8, 32], strides = [1, 1]} : vector<8x128xf32> to vector<8x32xf32>
    %51 = vector.extract_strided_slice %47 {offsets = [0, 96], sizes = [8, 32], strides = [1, 1]} : vector<8x128xf32> to vector<8x32xf32>
    %52 = arith.mulf %49, %24 : vector<8x32xf32>
    %53 = arith.mulf %48, %50 : vector<8x32xf32>
    %54 = arith.addf %52, %53 : vector<8x32xf32>
    %55 = math.tanh %54 : vector<8x32xf32>
    %56 = arith.mulf %51, %55 : vector<8x32xf32>
    %57 = arith.truncf %56 : vector<8x32xf32> to vector<8x32xbf16>
    %cst_29 = arith.constant dense<0.000000e+00> : vector<8x128xf32>
    %58 = tpu.matmul %57, %10, %cst_29 {dimension_numbers = #tpu.dot_dimension_numbers<[1], [0], [0], [1], [0, 0, 1, 1], [], []>} : vector<8x32xbf16>, vector<32x128xbf16>, vector<8x128xf32> -> vector<8x128xf32>
    %59 = arith.truncf %25 : vector<8x32xf32> to vector<8x32xbf16>
    %cst_30 = arith.constant dense<0.000000e+00> : vector<8x128xf32>
    %60 = tpu.matmul %59, %11, %cst_30 {dimension_numbers = #tpu.dot_dimension_numbers<[1], [0], [0], [1], [0, 0, 1, 1], [], []>} : vector<8x32xbf16>, vector<32x128xbf16>, vector<8x128xf32> -> vector<8x128xf32>
    %61 = arith.addf %58, %60 : vector<8x128xf32>
    %62 = arith.addf %61, %14 : vector<8x128xf32>
    %cst_31 = arith.constant 2.000000e+00 : f32
    %63 = vector.broadcast %cst_31 : f32 to vector<8x128xf32>
    %64 = arith.mulf %62, %63 : vector<8x128xf32>
    %65 = arith.select %22, %64, %62 : vector<8x128xi1>, vector<8x128xf32>
    %66 = arith.negf %65 : vector<8x128xf32>
    %67 = math.exp %66 : vector<8x128xf32>
    %cst_32 = arith.constant 1.000000e+00 : f32
    %68 = vector.broadcast %cst_32 : f32 to vector<8x128xf32>
    %69 = arith.addf %68, %67 : vector<8x128xf32>
    %70 = arith.divf %68, %69 : vector<8x128xf32>
    %cst_33 = arith.constant 2.000000e+00 : f32
    %71 = vector.broadcast %cst_33 : f32 to vector<8x128xf32>
    %72 = arith.mulf %71, %70 : vector<8x128xf32>
    %cst_34 = arith.constant 1.000000e+00 : f32
    %73 = vector.broadcast %cst_34 : f32 to vector<8x128xf32>
    %74 = arith.subf %72, %73 : vector<8x128xf32>
    %75 = arith.select %22, %74, %70 : vector<8x128xi1>, vector<8x128xf32>
    %76 = vector.extract_strided_slice %75 {offsets = [0, 0], sizes = [8, 32], strides = [1, 1]} : vector<8x128xf32> to vector<8x32xf32>
    %77 = vector.extract_strided_slice %75 {offsets = [0, 32], sizes = [8, 32], strides = [1, 1]} : vector<8x128xf32> to vector<8x32xf32>
    %78 = vector.extract_strided_slice %75 {offsets = [0, 64], sizes = [8, 32], strides = [1, 1]} : vector<8x128xf32> to vector<8x32xf32>
    %79 = vector.extract_strided_slice %75 {offsets = [0, 96], sizes = [8, 32], strides = [1, 1]} : vector<8x128xf32> to vector<8x32xf32>
    %80 = arith.mulf %77, %26 : vector<8x32xf32>
    %81 = arith.mulf %76, %78 : vector<8x32xf32>
    %82 = arith.addf %80, %81 : vector<8x32xf32>
    %83 = math.tanh %82 : vector<8x32xf32>
    %84 = arith.mulf %79, %83 : vector<8x32xf32>
    %c1_i32 = arith.constant 1 : i32
    %c8_i32_35 = arith.constant 8 : i32
    %85 = arith.muli %c1_i32, %c8_i32_35 : i32
    %86 = tpu.assume_multiple %85, 8 : i32
    %87 = arith.index_cast %86 : i32 to index
    %c0_36 = arith.constant 0 : index
    %88 = vector.load %arg10[%87, %c0_36] : memref<64x128xbf16, #tpu.memory_space<vmem>>, vector<8x128xbf16>
    %89 = arith.extf %88 : vector<8x128xbf16> to vector<8x128xf32>
    %90 = arith.truncf %56 : vector<8x32xf32> to vector<8x32xbf16>
    %cst_37 = arith.constant dense<0.000000e+00> : vector<8x128xf32>
    %91 = tpu.matmul %90, %9, %cst_37 {dimension_numbers = #tpu.dot_dimension_numbers<[1], [0], [0], [1], [0, 0, 1, 1], [], []>} : vector<8x32xbf16>, vector<32x128xbf16>, vector<8x128xf32> -> vector<8x128xf32>
    %92 = arith.addf %89, %91 : vector<8x128xf32>
    %cst_38 = arith.constant 2.000000e+00 : f32
    %93 = vector.broadcast %cst_38 : f32 to vector<8x128xf32>
    %94 = arith.mulf %92, %93 : vector<8x128xf32>
    %95 = arith.select %22, %94, %92 : vector<8x128xi1>, vector<8x128xf32>
    %96 = arith.negf %95 : vector<8x128xf32>
    %97 = math.exp %96 : vector<8x128xf32>
    %cst_39 = arith.constant 1.000000e+00 : f32
    %98 = vector.broadcast %cst_39 : f32 to vector<8x128xf32>
    %99 = arith.addf %98, %97 : vector<8x128xf32>
    %100 = arith.divf %98, %99 : vector<8x128xf32>
    %cst_40 = arith.constant 2.000000e+00 : f32
    %101 = vector.broadcast %cst_40 : f32 to vector<8x128xf32>
    %102 = arith.mulf %101, %100 : vector<8x128xf32>
    %cst_41 = arith.constant 1.000000e+00 : f32
    %103 = vector.broadcast %cst_41 : f32 to vector<8x128xf32>
    %104 = arith.subf %102, %103 : vector<8x128xf32>
    %105 = arith.select %22, %104, %100 : vector<8x128xi1>, vector<8x128xf32>
    %106 = vector.extract_strided_slice %105 {offsets = [0, 0], sizes = [8, 32], strides = [1, 1]} : vector<8x128xf32> to vector<8x32xf32>
    %107 = vector.extract_strided_slice %105 {offsets = [0, 32], sizes = [8, 32], strides = [1, 1]} : vector<8x128xf32> to vector<8x32xf32>
    %108 = vector.extract_strided_slice %105 {offsets = [0, 64], sizes = [8, 32], strides = [1, 1]} : vector<8x128xf32> to vector<8x32xf32>
    %109 = vector.extract_strided_slice %105 {offsets = [0, 96], sizes = [8, 32], strides = [1, 1]} : vector<8x128xf32> to vector<8x32xf32>
    %110 = arith.mulf %107, %54 : vector<8x32xf32>
    %111 = arith.mulf %106, %108 : vector<8x32xf32>
    %112 = arith.addf %110, %111 : vector<8x32xf32>
    %113 = math.tanh %112 : vector<8x32xf32>
    %114 = arith.mulf %109, %113 : vector<8x32xf32>
    %115 = arith.truncf %114 : vector<8x32xf32> to vector<8x32xbf16>
    %cst_42 = arith.constant dense<0.000000e+00> : vector<8x128xf32>
    %116 = tpu.matmul %115, %10, %cst_42 {dimension_numbers = #tpu.dot_dimension_numbers<[1], [0], [0], [1], [0, 0, 1, 1], [], []>} : vector<8x32xbf16>, vector<32x128xbf16>, vector<8x128xf32> -> vector<8x128xf32>
    %117 = arith.truncf %84 : vector<8x32xf32> to vector<8x32xbf16>
    %cst_43 = arith.constant dense<0.000000e+00> : vector<8x128xf32>
    %118 = tpu.matmul %117, %11, %cst_43 {dimension_numbers = #tpu.dot_dimension_numbers<[1], [0], [0], [1], [0, 0, 1, 1], [], []>} : vector<8x32xbf16>, vector<32x128xbf16>, vector<8x128xf32> -> vector<8x128xf32>
    %119 = arith.addf %116, %118 : vector<8x128xf32>
    %120 = arith.addf %119, %14 : vector<8x128xf32>
    %cst_44 = arith.constant 2.000000e+00 : f32
    %121 = vector.broadcast %cst_44 : f32 to vector<8x128xf32>
    %122 = arith.mulf %120, %121 : vector<8x128xf32>
    %123 = arith.select %22, %122, %120 : vector<8x128xi1>, vector<8x128xf32>
    %124 = arith.negf %123 : vector<8x128xf32>
    %125 = math.exp %124 : vector<8x128xf32>
    %cst_45 = arith.constant 1.000000e+00 : f32
    %126 = vector.broadcast %cst_45 : f32 to vector<8x128xf32>
    %127 = arith.addf %126, %125 : vector<8x128xf32>
    %128 = arith.divf %126, %127 : vector<8x128xf32>
    %cst_46 = arith.constant 2.000000e+00 : f32
    %129 = vector.broadcast %cst_46 : f32 to vector<8x128xf32>
    %130 = arith.mulf %129, %128 : vector<8x128xf32>
    %cst_47 = arith.constant 1.000000e+00 : f32
    %131 = vector.broadcast %cst_47 : f32 to vector<8x128xf32>
    %132 = arith.subf %130, %131 : vector<8x128xf32>
    %133 = arith.select %22, %132, %128 : vector<8x128xi1>, vector<8x128xf32>
    %134 = vector.extract_strided_slice %133 {offsets = [0, 0], sizes = [8, 32], strides = [1, 1]} : vector<8x128xf32> to vector<8x32xf32>
    %135 = vector.extract_strided_slice %133 {offsets = [0, 32], sizes = [8, 32], strides = [1, 1]} : vector<8x128xf32> to vector<8x32xf32>
    %136 = vector.extract_strided_slice %133 {offsets = [0, 64], sizes = [8, 32], strides = [1, 1]} : vector<8x128xf32> to vector<8x32xf32>
    %137 = vector.extract_strided_slice %133 {offsets = [0, 96], sizes = [8, 32], strides = [1, 1]} : vector<8x128xf32> to vector<8x32xf32>
    %138 = arith.mulf %135, %82 : vector<8x32xf32>
    %139 = arith.mulf %134, %136 : vector<8x32xf32>
    %140 = arith.addf %138, %139 : vector<8x32xf32>
    %141 = math.tanh %140 : vector<8x32xf32>
    %142 = arith.mulf %137, %141 : vector<8x32xf32>
    %c2_i32 = arith.constant 2 : i32
    %c8_i32_48 = arith.constant 8 : i32
    %143 = arith.muli %c2_i32, %c8_i32_48 : i32
    %144 = tpu.assume_multiple %143, 8 : i32
    %145 = arith.index_cast %144 : i32 to index
    %c0_49 = arith.constant 0 : index
    %146 = vector.load %arg10[%145, %c0_49] : memref<64x128xbf16, #tpu.memory_space<vmem>>, vector<8x128xbf16>
    %147 = arith.extf %146 : vector<8x128xbf16> to vector<8x128xf32>
    %148 = arith.truncf %114 : vector<8x32xf32> to vector<8x32xbf16>
    %cst_50 = arith.constant dense<0.000000e+00> : vector<8x128xf32>
    %149 = tpu.matmul %148, %9, %cst_50 {dimension_numbers = #tpu.dot_dimension_numbers<[1], [0], [0], [1], [0, 0, 1, 1], [], []>} : vector<8x32xbf16>, vector<32x128xbf16>, vector<8x128xf32> -> vector<8x128xf32>
    %150 = arith.addf %147, %149 : vector<8x128xf32>
    %cst_51 = arith.constant 2.000000e+00 : f32
    %151 = vector.broadcast %cst_51 : f32 to vector<8x128xf32>
    %152 = arith.mulf %150, %151 : vector<8x128xf32>
    %153 = arith.select %22, %152, %150 : vector<8x128xi1>, vector<8x128xf32>
    %154 = arith.negf %153 : vector<8x128xf32>
    %155 = math.exp %154 : vector<8x128xf32>
    %cst_52 = arith.constant 1.000000e+00 : f32
    %156 = vector.broadcast %cst_52 : f32 to vector<8x128xf32>
    %157 = arith.addf %156, %155 : vector<8x128xf32>
    %158 = arith.divf %156, %157 : vector<8x128xf32>
    %cst_53 = arith.constant 2.000000e+00 : f32
    %159 = vector.broadcast %cst_53 : f32 to vector<8x128xf32>
    %160 = arith.mulf %159, %158 : vector<8x128xf32>
    %cst_54 = arith.constant 1.000000e+00 : f32
    %161 = vector.broadcast %cst_54 : f32 to vector<8x128xf32>
    %162 = arith.subf %160, %161 : vector<8x128xf32>
    %163 = arith.select %22, %162, %158 : vector<8x128xi1>, vector<8x128xf32>
    %164 = vector.extract_strided_slice %163 {offsets = [0, 0], sizes = [8, 32], strides = [1, 1]} : vector<8x128xf32> to vector<8x32xf32>
    %165 = vector.extract_strided_slice %163 {offsets = [0, 32], sizes = [8, 32], strides = [1, 1]} : vector<8x128xf32> to vector<8x32xf32>
    %166 = vector.extract_strided_slice %163 {offsets = [0, 64], sizes = [8, 32], strides = [1, 1]} : vector<8x128xf32> to vector<8x32xf32>
    %167 = vector.extract_strided_slice %163 {offsets = [0, 96], sizes = [8, 32], strides = [1, 1]} : vector<8x128xf32> to vector<8x32xf32>
    %168 = arith.mulf %165, %112 : vector<8x32xf32>
    %169 = arith.mulf %164, %166 : vector<8x32xf32>
    %170 = arith.addf %168, %169 : vector<8x32xf32>
    %171 = math.tanh %170 : vector<8x32xf32>
    %172 = arith.mulf %167, %171 : vector<8x32xf32>
    %173 = arith.truncf %172 : vector<8x32xf32> to vector<8x32xbf16>
    %cst_55 = arith.constant dense<0.000000e+00> : vector<8x128xf32>
    %174 = tpu.matmul %173, %10, %cst_55 {dimension_numbers = #tpu.dot_dimension_numbers<[1], [0], [0], [1], [0, 0, 1, 1], [], []>} : vector<8x32xbf16>, vector<32x128xbf16>, vector<8x128xf32> -> vector<8x128xf32>
    %175 = arith.truncf %142 : vector<8x32xf32> to vector<8x32xbf16>
    %cst_56 = arith.constant dense<0.000000e+00> : vector<8x128xf32>
    %176 = tpu.matmul %175, %11, %cst_56 {dimension_numbers = #tpu.dot_dimension_numbers<[1], [0], [0], [1], [0, 0, 1, 1], [], []>} : vector<8x32xbf16>, vector<32x128xbf16>, vector<8x128xf32> -> vector<8x128xf32>
    %177 = arith.addf %174, %176 : vector<8x128xf32>
    %178 = arith.addf %177, %14 : vector<8x128xf32>
    %cst_57 = arith.constant 2.000000e+00 : f32
    %179 = vector.broadcast %cst_57 : f32 to vector<8x128xf32>
    %180 = arith.mulf %178, %179 : vector<8x128xf32>
    %181 = arith.select %22, %180, %178 : vector<8x128xi1>, vector<8x128xf32>
    %182 = arith.negf %181 : vector<8x128xf32>
    %183 = math.exp %182 : vector<8x128xf32>
    %cst_58 = arith.constant 1.000000e+00 : f32
    %184 = vector.broadcast %cst_58 : f32 to vector<8x128xf32>
    %185 = arith.addf %184, %183 : vector<8x128xf32>
    %186 = arith.divf %184, %185 : vector<8x128xf32>
    %cst_59 = arith.constant 2.000000e+00 : f32
    %187 = vector.broadcast %cst_59 : f32 to vector<8x128xf32>
    %188 = arith.mulf %187, %186 : vector<8x128xf32>
    %cst_60 = arith.constant 1.000000e+00 : f32
    %189 = vector.broadcast %cst_60 : f32 to vector<8x128xf32>
    %190 = arith.subf %188, %189 : vector<8x128xf32>
    %191 = arith.select %22, %190, %186 : vector<8x128xi1>, vector<8x128xf32>
    %192 = vector.extract_strided_slice %191 {offsets = [0, 0], sizes = [8, 32], strides = [1, 1]} : vector<8x128xf32> to vector<8x32xf32>
    %193 = vector.extract_strided_slice %191 {offsets = [0, 32], sizes = [8, 32], strides = [1, 1]} : vector<8x128xf32> to vector<8x32xf32>
    %194 = vector.extract_strided_slice %191 {offsets = [0, 64], sizes = [8, 32], strides = [1, 1]} : vector<8x128xf32> to vector<8x32xf32>
    %195 = vector.extract_strided_slice %191 {offsets = [0, 96], sizes = [8, 32], strides = [1, 1]} : vector<8x128xf32> to vector<8x32xf32>
    %196 = arith.mulf %193, %140 : vector<8x32xf32>
    %197 = arith.mulf %192, %194 : vector<8x32xf32>
    %198 = arith.addf %196, %197 : vector<8x32xf32>
    %199 = math.tanh %198 : vector<8x32xf32>
    %200 = arith.mulf %195, %199 : vector<8x32xf32>
    %c3_i32 = arith.constant 3 : i32
    %c8_i32_61 = arith.constant 8 : i32
    %201 = arith.muli %c3_i32, %c8_i32_61 : i32
    %202 = tpu.assume_multiple %201, 8 : i32
    %203 = arith.index_cast %202 : i32 to index
    %c0_62 = arith.constant 0 : index
    %204 = vector.load %arg10[%203, %c0_62] : memref<64x128xbf16, #tpu.memory_space<vmem>>, vector<8x128xbf16>
    %205 = arith.extf %204 : vector<8x128xbf16> to vector<8x128xf32>
    %206 = arith.truncf %172 : vector<8x32xf32> to vector<8x32xbf16>
    %cst_63 = arith.constant dense<0.000000e+00> : vector<8x128xf32>
    %207 = tpu.matmul %206, %9, %cst_63 {dimension_numbers = #tpu.dot_dimension_numbers<[1], [0], [0], [1], [0, 0, 1, 1], [], []>} : vector<8x32xbf16>, vector<32x128xbf16>, vector<8x128xf32> -> vector<8x128xf32>
    %208 = arith.addf %205, %207 : vector<8x128xf32>
    %cst_64 = arith.constant 2.000000e+00 : f32
    %209 = vector.broadcast %cst_64 : f32 to vector<8x128xf32>
    %210 = arith.mulf %208, %209 : vector<8x128xf32>
    %211 = arith.select %22, %210, %208 : vector<8x128xi1>, vector<8x128xf32>
    %212 = arith.negf %211 : vector<8x128xf32>
    %213 = math.exp %212 : vector<8x128xf32>
    %cst_65 = arith.constant 1.000000e+00 : f32
    %214 = vector.broadcast %cst_65 : f32 to vector<8x128xf32>
    %215 = arith.addf %214, %213 : vector<8x128xf32>
    %216 = arith.divf %214, %215 : vector<8x128xf32>
    %cst_66 = arith.constant 2.000000e+00 : f32
    %217 = vector.broadcast %cst_66 : f32 to vector<8x128xf32>
    %218 = arith.mulf %217, %216 : vector<8x128xf32>
    %cst_67 = arith.constant 1.000000e+00 : f32
    %219 = vector.broadcast %cst_67 : f32 to vector<8x128xf32>
    %220 = arith.subf %218, %219 : vector<8x128xf32>
    %221 = arith.select %22, %220, %216 : vector<8x128xi1>, vector<8x128xf32>
    %222 = vector.extract_strided_slice %221 {offsets = [0, 0], sizes = [8, 32], strides = [1, 1]} : vector<8x128xf32> to vector<8x32xf32>
    %223 = vector.extract_strided_slice %221 {offsets = [0, 32], sizes = [8, 32], strides = [1, 1]} : vector<8x128xf32> to vector<8x32xf32>
    %224 = vector.extract_strided_slice %221 {offsets = [0, 64], sizes = [8, 32], strides = [1, 1]} : vector<8x128xf32> to vector<8x32xf32>
    %225 = vector.extract_strided_slice %221 {offsets = [0, 96], sizes = [8, 32], strides = [1, 1]} : vector<8x128xf32> to vector<8x32xf32>
    %226 = arith.mulf %223, %170 : vector<8x32xf32>
    %227 = arith.mulf %222, %224 : vector<8x32xf32>
    %228 = arith.addf %226, %227 : vector<8x32xf32>
    %229 = math.tanh %228 : vector<8x32xf32>
    %230 = arith.mulf %225, %229 : vector<8x32xf32>
    %231 = arith.truncf %230 : vector<8x32xf32> to vector<8x32xbf16>
    %cst_68 = arith.constant dense<0.000000e+00> : vector<8x128xf32>
    %232 = tpu.matmul %231, %10, %cst_68 {dimension_numbers = #tpu.dot_dimension_numbers<[1], [0], [0], [1], [0, 0, 1, 1], [], []>} : vector<8x32xbf16>, vector<32x128xbf16>, vector<8x128xf32> -> vector<8x128xf32>
    %233 = arith.truncf %200 : vector<8x32xf32> to vector<8x32xbf16>
    %cst_69 = arith.constant dense<0.000000e+00> : vector<8x128xf32>
    %234 = tpu.matmul %233, %11, %cst_69 {dimension_numbers = #tpu.dot_dimension_numbers<[1], [0], [0], [1], [0, 0, 1, 1], [], []>} : vector<8x32xbf16>, vector<32x128xbf16>, vector<8x128xf32> -> vector<8x128xf32>
    %235 = arith.addf %232, %234 : vector<8x128xf32>
    %236 = arith.addf %235, %14 : vector<8x128xf32>
    %cst_70 = arith.constant 2.000000e+00 : f32
    %237 = vector.broadcast %cst_70 : f32 to vector<8x128xf32>
    %238 = arith.mulf %236, %237 : vector<8x128xf32>
    %239 = arith.select %22, %238, %236 : vector<8x128xi1>, vector<8x128xf32>
    %240 = arith.negf %239 : vector<8x128xf32>
    %241 = math.exp %240 : vector<8x128xf32>
    %cst_71 = arith.constant 1.000000e+00 : f32
    %242 = vector.broadcast %cst_71 : f32 to vector<8x128xf32>
    %243 = arith.addf %242, %241 : vector<8x128xf32>
    %244 = arith.divf %242, %243 : vector<8x128xf32>
    %cst_72 = arith.constant 2.000000e+00 : f32
    %245 = vector.broadcast %cst_72 : f32 to vector<8x128xf32>
    %246 = arith.mulf %245, %244 : vector<8x128xf32>
    %cst_73 = arith.constant 1.000000e+00 : f32
    %247 = vector.broadcast %cst_73 : f32 to vector<8x128xf32>
    %248 = arith.subf %246, %247 : vector<8x128xf32>
    %249 = arith.select %22, %248, %244 : vector<8x128xi1>, vector<8x128xf32>
    %250 = vector.extract_strided_slice %249 {offsets = [0, 0], sizes = [8, 32], strides = [1, 1]} : vector<8x128xf32> to vector<8x32xf32>
    %251 = vector.extract_strided_slice %249 {offsets = [0, 32], sizes = [8, 32], strides = [1, 1]} : vector<8x128xf32> to vector<8x32xf32>
    %252 = vector.extract_strided_slice %249 {offsets = [0, 64], sizes = [8, 32], strides = [1, 1]} : vector<8x128xf32> to vector<8x32xf32>
    %253 = vector.extract_strided_slice %249 {offsets = [0, 96], sizes = [8, 32], strides = [1, 1]} : vector<8x128xf32> to vector<8x32xf32>
    %254 = arith.mulf %251, %198 : vector<8x32xf32>
    %255 = arith.mulf %250, %252 : vector<8x32xf32>
    %256 = arith.addf %254, %255 : vector<8x32xf32>
    %257 = math.tanh %256 : vector<8x32xf32>
    %258 = arith.mulf %253, %257 : vector<8x32xf32>
    %c4_i32 = arith.constant 4 : i32
    %c8_i32_74 = arith.constant 8 : i32
    %259 = arith.muli %c4_i32, %c8_i32_74 : i32
    %260 = tpu.assume_multiple %259, 8 : i32
    %261 = arith.index_cast %260 : i32 to index
    %c0_75 = arith.constant 0 : index
    %262 = vector.load %arg10[%261, %c0_75] : memref<64x128xbf16, #tpu.memory_space<vmem>>, vector<8x128xbf16>
    %263 = arith.extf %262 : vector<8x128xbf16> to vector<8x128xf32>
    %264 = arith.truncf %230 : vector<8x32xf32> to vector<8x32xbf16>
    %cst_76 = arith.constant dense<0.000000e+00> : vector<8x128xf32>
    %265 = tpu.matmul %264, %9, %cst_76 {dimension_numbers = #tpu.dot_dimension_numbers<[1], [0], [0], [1], [0, 0, 1, 1], [], []>} : vector<8x32xbf16>, vector<32x128xbf16>, vector<8x128xf32> -> vector<8x128xf32>
    %266 = arith.addf %263, %265 : vector<8x128xf32>
    %cst_77 = arith.constant 2.000000e+00 : f32
    %267 = vector.broadcast %cst_77 : f32 to vector<8x128xf32>
    %268 = arith.mulf %266, %267 : vector<8x128xf32>
    %269 = arith.select %22, %268, %266 : vector<8x128xi1>, vector<8x128xf32>
    %270 = arith.negf %269 : vector<8x128xf32>
    %271 = math.exp %270 : vector<8x128xf32>
    %cst_78 = arith.constant 1.000000e+00 : f32
    %272 = vector.broadcast %cst_78 : f32 to vector<8x128xf32>
    %273 = arith.addf %272, %271 : vector<8x128xf32>
    %274 = arith.divf %272, %273 : vector<8x128xf32>
    %cst_79 = arith.constant 2.000000e+00 : f32
    %275 = vector.broadcast %cst_79 : f32 to vector<8x128xf32>
    %276 = arith.mulf %275, %274 : vector<8x128xf32>
    %cst_80 = arith.constant 1.000000e+00 : f32
    %277 = vector.broadcast %cst_80 : f32 to vector<8x128xf32>
    %278 = arith.subf %276, %277 : vector<8x128xf32>
    %279 = arith.select %22, %278, %274 : vector<8x128xi1>, vector<8x128xf32>
    %280 = vector.extract_strided_slice %279 {offsets = [0, 0], sizes = [8, 32], strides = [1, 1]} : vector<8x128xf32> to vector<8x32xf32>
    %281 = vector.extract_strided_slice %279 {offsets = [0, 32], sizes = [8, 32], strides = [1, 1]} : vector<8x128xf32> to vector<8x32xf32>
    %282 = vector.extract_strided_slice %279 {offsets = [0, 64], sizes = [8, 32], strides = [1, 1]} : vector<8x128xf32> to vector<8x32xf32>
    %283 = vector.extract_strided_slice %279 {offsets = [0, 96], sizes = [8, 32], strides = [1, 1]} : vector<8x128xf32> to vector<8x32xf32>
    %284 = arith.mulf %281, %228 : vector<8x32xf32>
    %285 = arith.mulf %280, %282 : vector<8x32xf32>
    %286 = arith.addf %284, %285 : vector<8x32xf32>
    %287 = math.tanh %286 : vector<8x32xf32>
    %288 = arith.mulf %283, %287 : vector<8x32xf32>
    %289 = arith.truncf %288 : vector<8x32xf32> to vector<8x32xbf16>
    %cst_81 = arith.constant dense<0.000000e+00> : vector<8x128xf32>
    %290 = tpu.matmul %289, %10, %cst_81 {dimension_numbers = #tpu.dot_dimension_numbers<[1], [0], [0], [1], [0, 0, 1, 1], [], []>} : vector<8x32xbf16>, vector<32x128xbf16>, vector<8x128xf32> -> vector<8x128xf32>
    %291 = arith.truncf %258 : vector<8x32xf32> to vector<8x32xbf16>
    %cst_82 = arith.constant dense<0.000000e+00> : vector<8x128xf32>
    %292 = tpu.matmul %291, %11, %cst_82 {dimension_numbers = #tpu.dot_dimension_numbers<[1], [0], [0], [1], [0, 0, 1, 1], [], []>} : vector<8x32xbf16>, vector<32x128xbf16>, vector<8x128xf32> -> vector<8x128xf32>
    %293 = arith.addf %290, %292 : vector<8x128xf32>
    %294 = arith.addf %293, %14 : vector<8x128xf32>
    %cst_83 = arith.constant 2.000000e+00 : f32
    %295 = vector.broadcast %cst_83 : f32 to vector<8x128xf32>
    %296 = arith.mulf %294, %295 : vector<8x128xf32>
    %297 = arith.select %22, %296, %294 : vector<8x128xi1>, vector<8x128xf32>
    %298 = arith.negf %297 : vector<8x128xf32>
    %299 = math.exp %298 : vector<8x128xf32>
    %cst_84 = arith.constant 1.000000e+00 : f32
    %300 = vector.broadcast %cst_84 : f32 to vector<8x128xf32>
    %301 = arith.addf %300, %299 : vector<8x128xf32>
    %302 = arith.divf %300, %301 : vector<8x128xf32>
    %cst_85 = arith.constant 2.000000e+00 : f32
    %303 = vector.broadcast %cst_85 : f32 to vector<8x128xf32>
    %304 = arith.mulf %303, %302 : vector<8x128xf32>
    %cst_86 = arith.constant 1.000000e+00 : f32
    %305 = vector.broadcast %cst_86 : f32 to vector<8x128xf32>
    %306 = arith.subf %304, %305 : vector<8x128xf32>
    %307 = arith.select %22, %306, %302 : vector<8x128xi1>, vector<8x128xf32>
    %308 = vector.extract_strided_slice %307 {offsets = [0, 0], sizes = [8, 32], strides = [1, 1]} : vector<8x128xf32> to vector<8x32xf32>
    %309 = vector.extract_strided_slice %307 {offsets = [0, 32], sizes = [8, 32], strides = [1, 1]} : vector<8x128xf32> to vector<8x32xf32>
    %310 = vector.extract_strided_slice %307 {offsets = [0, 64], sizes = [8, 32], strides = [1, 1]} : vector<8x128xf32> to vector<8x32xf32>
    %311 = vector.extract_strided_slice %307 {offsets = [0, 96], sizes = [8, 32], strides = [1, 1]} : vector<8x128xf32> to vector<8x32xf32>
    %312 = arith.mulf %309, %256 : vector<8x32xf32>
    %313 = arith.mulf %308, %310 : vector<8x32xf32>
    %314 = arith.addf %312, %313 : vector<8x32xf32>
    %315 = math.tanh %314 : vector<8x32xf32>
    %316 = arith.mulf %311, %315 : vector<8x32xf32>
    %c5_i32 = arith.constant 5 : i32
    %c8_i32_87 = arith.constant 8 : i32
    %317 = arith.muli %c5_i32, %c8_i32_87 : i32
    %318 = tpu.assume_multiple %317, 8 : i32
    %319 = arith.index_cast %318 : i32 to index
    %c0_88 = arith.constant 0 : index
    %320 = vector.load %arg10[%319, %c0_88] : memref<64x128xbf16, #tpu.memory_space<vmem>>, vector<8x128xbf16>
    %321 = arith.extf %320 : vector<8x128xbf16> to vector<8x128xf32>
    %322 = arith.truncf %288 : vector<8x32xf32> to vector<8x32xbf16>
    %cst_89 = arith.constant dense<0.000000e+00> : vector<8x128xf32>
    %323 = tpu.matmul %322, %9, %cst_89 {dimension_numbers = #tpu.dot_dimension_numbers<[1], [0], [0], [1], [0, 0, 1, 1], [], []>} : vector<8x32xbf16>, vector<32x128xbf16>, vector<8x128xf32> -> vector<8x128xf32>
    %324 = arith.addf %321, %323 : vector<8x128xf32>
    %cst_90 = arith.constant 2.000000e+00 : f32
    %325 = vector.broadcast %cst_90 : f32 to vector<8x128xf32>
    %326 = arith.mulf %324, %325 : vector<8x128xf32>
    %327 = arith.select %22, %326, %324 : vector<8x128xi1>, vector<8x128xf32>
    %328 = arith.negf %327 : vector<8x128xf32>
    %329 = math.exp %328 : vector<8x128xf32>
    %cst_91 = arith.constant 1.000000e+00 : f32
    %330 = vector.broadcast %cst_91 : f32 to vector<8x128xf32>
    %331 = arith.addf %330, %329 : vector<8x128xf32>
    %332 = arith.divf %330, %331 : vector<8x128xf32>
    %cst_92 = arith.constant 2.000000e+00 : f32
    %333 = vector.broadcast %cst_92 : f32 to vector<8x128xf32>
    %334 = arith.mulf %333, %332 : vector<8x128xf32>
    %cst_93 = arith.constant 1.000000e+00 : f32
    %335 = vector.broadcast %cst_93 : f32 to vector<8x128xf32>
    %336 = arith.subf %334, %335 : vector<8x128xf32>
    %337 = arith.select %22, %336, %332 : vector<8x128xi1>, vector<8x128xf32>
    %338 = vector.extract_strided_slice %337 {offsets = [0, 0], sizes = [8, 32], strides = [1, 1]} : vector<8x128xf32> to vector<8x32xf32>
    %339 = vector.extract_strided_slice %337 {offsets = [0, 32], sizes = [8, 32], strides = [1, 1]} : vector<8x128xf32> to vector<8x32xf32>
    %340 = vector.extract_strided_slice %337 {offsets = [0, 64], sizes = [8, 32], strides = [1, 1]} : vector<8x128xf32> to vector<8x32xf32>
    %341 = vector.extract_strided_slice %337 {offsets = [0, 96], sizes = [8, 32], strides = [1, 1]} : vector<8x128xf32> to vector<8x32xf32>
    %342 = arith.mulf %339, %286 : vector<8x32xf32>
    %343 = arith.mulf %338, %340 : vector<8x32xf32>
    %344 = arith.addf %342, %343 : vector<8x32xf32>
    %345 = math.tanh %344 : vector<8x32xf32>
    %346 = arith.mulf %341, %345 : vector<8x32xf32>
    %347 = arith.truncf %346 : vector<8x32xf32> to vector<8x32xbf16>
    %cst_94 = arith.constant dense<0.000000e+00> : vector<8x128xf32>
    %348 = tpu.matmul %347, %10, %cst_94 {dimension_numbers = #tpu.dot_dimension_numbers<[1], [0], [0], [1], [0, 0, 1, 1], [], []>} : vector<8x32xbf16>, vector<32x128xbf16>, vector<8x128xf32> -> vector<8x128xf32>
    %349 = arith.truncf %316 : vector<8x32xf32> to vector<8x32xbf16>
    %cst_95 = arith.constant dense<0.000000e+00> : vector<8x128xf32>
    %350 = tpu.matmul %349, %11, %cst_95 {dimension_numbers = #tpu.dot_dimension_numbers<[1], [0], [0], [1], [0, 0, 1, 1], [], []>} : vector<8x32xbf16>, vector<32x128xbf16>, vector<8x128xf32> -> vector<8x128xf32>
    %351 = arith.addf %348, %350 : vector<8x128xf32>
    %352 = arith.addf %351, %14 : vector<8x128xf32>
    %cst_96 = arith.constant 2.000000e+00 : f32
    %353 = vector.broadcast %cst_96 : f32 to vector<8x128xf32>
    %354 = arith.mulf %352, %353 : vector<8x128xf32>
    %355 = arith.select %22, %354, %352 : vector<8x128xi1>, vector<8x128xf32>
    %356 = arith.negf %355 : vector<8x128xf32>
    %357 = math.exp %356 : vector<8x128xf32>
    %cst_97 = arith.constant 1.000000e+00 : f32
    %358 = vector.broadcast %cst_97 : f32 to vector<8x128xf32>
    %359 = arith.addf %358, %357 : vector<8x128xf32>
    %360 = arith.divf %358, %359 : vector<8x128xf32>
    %cst_98 = arith.constant 2.000000e+00 : f32
    %361 = vector.broadcast %cst_98 : f32 to vector<8x128xf32>
    %362 = arith.mulf %361, %360 : vector<8x128xf32>
    %cst_99 = arith.constant 1.000000e+00 : f32
    %363 = vector.broadcast %cst_99 : f32 to vector<8x128xf32>
    %364 = arith.subf %362, %363 : vector<8x128xf32>
    %365 = arith.select %22, %364, %360 : vector<8x128xi1>, vector<8x128xf32>
    %366 = vector.extract_strided_slice %365 {offsets = [0, 0], sizes = [8, 32], strides = [1, 1]} : vector<8x128xf32> to vector<8x32xf32>
    %367 = vector.extract_strided_slice %365 {offsets = [0, 32], sizes = [8, 32], strides = [1, 1]} : vector<8x128xf32> to vector<8x32xf32>
    %368 = vector.extract_strided_slice %365 {offsets = [0, 64], sizes = [8, 32], strides = [1, 1]} : vector<8x128xf32> to vector<8x32xf32>
    %369 = vector.extract_strided_slice %365 {offsets = [0, 96], sizes = [8, 32], strides = [1, 1]} : vector<8x128xf32> to vector<8x32xf32>
    %370 = arith.mulf %367, %314 : vector<8x32xf32>
    %371 = arith.mulf %366, %368 : vector<8x32xf32>
    %372 = arith.addf %370, %371 : vector<8x32xf32>
    %373 = math.tanh %372 : vector<8x32xf32>
    %374 = arith.mulf %369, %373 : vector<8x32xf32>
    %c6_i32 = arith.constant 6 : i32
    %c8_i32_100 = arith.constant 8 : i32
    %375 = arith.muli %c6_i32, %c8_i32_100 : i32
    %376 = tpu.assume_multiple %375, 8 : i32
    %377 = arith.index_cast %376 : i32 to index
    %c0_101 = arith.constant 0 : index
    %378 = vector.load %arg10[%377, %c0_101] : memref<64x128xbf16, #tpu.memory_space<vmem>>, vector<8x128xbf16>
    %379 = arith.extf %378 : vector<8x128xbf16> to vector<8x128xf32>
    %380 = arith.truncf %346 : vector<8x32xf32> to vector<8x32xbf16>
    %cst_102 = arith.constant dense<0.000000e+00> : vector<8x128xf32>
    %381 = tpu.matmul %380, %9, %cst_102 {dimension_numbers = #tpu.dot_dimension_numbers<[1], [0], [0], [1], [0, 0, 1, 1], [], []>} : vector<8x32xbf16>, vector<32x128xbf16>, vector<8x128xf32> -> vector<8x128xf32>
    %382 = arith.addf %379, %381 : vector<8x128xf32>
    %cst_103 = arith.constant 2.000000e+00 : f32
    %383 = vector.broadcast %cst_103 : f32 to vector<8x128xf32>
    %384 = arith.mulf %382, %383 : vector<8x128xf32>
    %385 = arith.select %22, %384, %382 : vector<8x128xi1>, vector<8x128xf32>
    %386 = arith.negf %385 : vector<8x128xf32>
    %387 = math.exp %386 : vector<8x128xf32>
    %cst_104 = arith.constant 1.000000e+00 : f32
    %388 = vector.broadcast %cst_104 : f32 to vector<8x128xf32>
    %389 = arith.addf %388, %387 : vector<8x128xf32>
    %390 = arith.divf %388, %389 : vector<8x128xf32>
    %cst_105 = arith.constant 2.000000e+00 : f32
    %391 = vector.broadcast %cst_105 : f32 to vector<8x128xf32>
    %392 = arith.mulf %391, %390 : vector<8x128xf32>
    %cst_106 = arith.constant 1.000000e+00 : f32
    %393 = vector.broadcast %cst_106 : f32 to vector<8x128xf32>
    %394 = arith.subf %392, %393 : vector<8x128xf32>
    %395 = arith.select %22, %394, %390 : vector<8x128xi1>, vector<8x128xf32>
    %396 = vector.extract_strided_slice %395 {offsets = [0, 0], sizes = [8, 32], strides = [1, 1]} : vector<8x128xf32> to vector<8x32xf32>
    %397 = vector.extract_strided_slice %395 {offsets = [0, 32], sizes = [8, 32], strides = [1, 1]} : vector<8x128xf32> to vector<8x32xf32>
    %398 = vector.extract_strided_slice %395 {offsets = [0, 64], sizes = [8, 32], strides = [1, 1]} : vector<8x128xf32> to vector<8x32xf32>
    %399 = vector.extract_strided_slice %395 {offsets = [0, 96], sizes = [8, 32], strides = [1, 1]} : vector<8x128xf32> to vector<8x32xf32>
    %400 = arith.mulf %397, %344 : vector<8x32xf32>
    %401 = arith.mulf %396, %398 : vector<8x32xf32>
    %402 = arith.addf %400, %401 : vector<8x32xf32>
    %403 = math.tanh %402 : vector<8x32xf32>
    %404 = arith.mulf %399, %403 : vector<8x32xf32>
    %405 = arith.truncf %404 : vector<8x32xf32> to vector<8x32xbf16>
    %cst_107 = arith.constant dense<0.000000e+00> : vector<8x128xf32>
    %406 = tpu.matmul %405, %10, %cst_107 {dimension_numbers = #tpu.dot_dimension_numbers<[1], [0], [0], [1], [0, 0, 1, 1], [], []>} : vector<8x32xbf16>, vector<32x128xbf16>, vector<8x128xf32> -> vector<8x128xf32>
    %407 = arith.truncf %374 : vector<8x32xf32> to vector<8x32xbf16>
    %cst_108 = arith.constant dense<0.000000e+00> : vector<8x128xf32>
    %408 = tpu.matmul %407, %11, %cst_108 {dimension_numbers = #tpu.dot_dimension_numbers<[1], [0], [0], [1], [0, 0, 1, 1], [], []>} : vector<8x32xbf16>, vector<32x128xbf16>, vector<8x128xf32> -> vector<8x128xf32>
    %409 = arith.addf %406, %408 : vector<8x128xf32>
    %410 = arith.addf %409, %14 : vector<8x128xf32>
    %cst_109 = arith.constant 2.000000e+00 : f32
    %411 = vector.broadcast %cst_109 : f32 to vector<8x128xf32>
    %412 = arith.mulf %410, %411 : vector<8x128xf32>
    %413 = arith.select %22, %412, %410 : vector<8x128xi1>, vector<8x128xf32>
    %414 = arith.negf %413 : vector<8x128xf32>
    %415 = math.exp %414 : vector<8x128xf32>
    %cst_110 = arith.constant 1.000000e+00 : f32
    %416 = vector.broadcast %cst_110 : f32 to vector<8x128xf32>
    %417 = arith.addf %416, %415 : vector<8x128xf32>
    %418 = arith.divf %416, %417 : vector<8x128xf32>
    %cst_111 = arith.constant 2.000000e+00 : f32
    %419 = vector.broadcast %cst_111 : f32 to vector<8x128xf32>
    %420 = arith.mulf %419, %418 : vector<8x128xf32>
    %cst_112 = arith.constant 1.000000e+00 : f32
    %421 = vector.broadcast %cst_112 : f32 to vector<8x128xf32>
    %422 = arith.subf %420, %421 : vector<8x128xf32>
    %423 = arith.select %22, %422, %418 : vector<8x128xi1>, vector<8x128xf32>
    %424 = vector.extract_strided_slice %423 {offsets = [0, 0], sizes = [8, 32], strides = [1, 1]} : vector<8x128xf32> to vector<8x32xf32>
    %425 = vector.extract_strided_slice %423 {offsets = [0, 32], sizes = [8, 32], strides = [1, 1]} : vector<8x128xf32> to vector<8x32xf32>
    %426 = vector.extract_strided_slice %423 {offsets = [0, 64], sizes = [8, 32], strides = [1, 1]} : vector<8x128xf32> to vector<8x32xf32>
    %427 = vector.extract_strided_slice %423 {offsets = [0, 96], sizes = [8, 32], strides = [1, 1]} : vector<8x128xf32> to vector<8x32xf32>
    %428 = arith.mulf %425, %372 : vector<8x32xf32>
    %429 = arith.mulf %424, %426 : vector<8x32xf32>
    %430 = arith.addf %428, %429 : vector<8x32xf32>
    %431 = math.tanh %430 : vector<8x32xf32>
    %432 = arith.mulf %427, %431 : vector<8x32xf32>
    %c7_i32 = arith.constant 7 : i32
    %c8_i32_113 = arith.constant 8 : i32
    %433 = arith.muli %c7_i32, %c8_i32_113 : i32
    %434 = tpu.assume_multiple %433, 8 : i32
    %435 = arith.index_cast %434 : i32 to index
    %c0_114 = arith.constant 0 : index
    %436 = vector.load %arg10[%435, %c0_114] : memref<64x128xbf16, #tpu.memory_space<vmem>>, vector<8x128xbf16>
    %437 = arith.extf %436 : vector<8x128xbf16> to vector<8x128xf32>
    %438 = arith.truncf %404 : vector<8x32xf32> to vector<8x32xbf16>
    %cst_115 = arith.constant dense<0.000000e+00> : vector<8x128xf32>
    %439 = tpu.matmul %438, %9, %cst_115 {dimension_numbers = #tpu.dot_dimension_numbers<[1], [0], [0], [1], [0, 0, 1, 1], [], []>} : vector<8x32xbf16>, vector<32x128xbf16>, vector<8x128xf32> -> vector<8x128xf32>
    %440 = arith.addf %437, %439 : vector<8x128xf32>
    %cst_116 = arith.constant 2.000000e+00 : f32
    %441 = vector.broadcast %cst_116 : f32 to vector<8x128xf32>
    %442 = arith.mulf %440, %441 : vector<8x128xf32>
    %443 = arith.select %22, %442, %440 : vector<8x128xi1>, vector<8x128xf32>
    %444 = arith.negf %443 : vector<8x128xf32>
    %445 = math.exp %444 : vector<8x128xf32>
    %cst_117 = arith.constant 1.000000e+00 : f32
    %446 = vector.broadcast %cst_117 : f32 to vector<8x128xf32>
    %447 = arith.addf %446, %445 : vector<8x128xf32>
    %448 = arith.divf %446, %447 : vector<8x128xf32>
    %cst_118 = arith.constant 2.000000e+00 : f32
    %449 = vector.broadcast %cst_118 : f32 to vector<8x128xf32>
    %450 = arith.mulf %449, %448 : vector<8x128xf32>
    %cst_119 = arith.constant 1.000000e+00 : f32
    %451 = vector.broadcast %cst_119 : f32 to vector<8x128xf32>
    %452 = arith.subf %450, %451 : vector<8x128xf32>
    %453 = arith.select %22, %452, %448 : vector<8x128xi1>, vector<8x128xf32>
    %454 = vector.extract_strided_slice %453 {offsets = [0, 0], sizes = [8, 32], strides = [1, 1]} : vector<8x128xf32> to vector<8x32xf32>
    %455 = vector.extract_strided_slice %453 {offsets = [0, 32], sizes = [8, 32], strides = [1, 1]} : vector<8x128xf32> to vector<8x32xf32>
    %456 = vector.extract_strided_slice %453 {offsets = [0, 64], sizes = [8, 32], strides = [1, 1]} : vector<8x128xf32> to vector<8x32xf32>
    %457 = vector.extract_strided_slice %453 {offsets = [0, 96], sizes = [8, 32], strides = [1, 1]} : vector<8x128xf32> to vector<8x32xf32>
    %458 = arith.mulf %455, %402 : vector<8x32xf32>
    %459 = arith.mulf %454, %456 : vector<8x32xf32>
    %460 = arith.addf %458, %459 : vector<8x32xf32>
    %461 = math.tanh %460 : vector<8x32xf32>
    %462 = arith.mulf %457, %461 : vector<8x32xf32>
    %463 = arith.truncf %462 : vector<8x32xf32> to vector<8x32xbf16>
    %cst_120 = arith.constant dense<0.000000e+00> : vector<8x128xf32>
    %464 = tpu.matmul %463, %10, %cst_120 {dimension_numbers = #tpu.dot_dimension_numbers<[1], [0], [0], [1], [0, 0, 1, 1], [], []>} : vector<8x32xbf16>, vector<32x128xbf16>, vector<8x128xf32> -> vector<8x128xf32>
    %465 = arith.truncf %432 : vector<8x32xf32> to vector<8x32xbf16>
    %cst_121 = arith.constant dense<0.000000e+00> : vector<8x128xf32>
    %466 = tpu.matmul %465, %11, %cst_121 {dimension_numbers = #tpu.dot_dimension_numbers<[1], [0], [0], [1], [0, 0, 1, 1], [], []>} : vector<8x32xbf16>, vector<32x128xbf16>, vector<8x128xf32> -> vector<8x128xf32>
    %467 = arith.addf %464, %466 : vector<8x128xf32>
    %468 = arith.addf %467, %14 : vector<8x128xf32>
    %cst_122 = arith.constant 2.000000e+00 : f32
    %469 = vector.broadcast %cst_122 : f32 to vector<8x128xf32>
    %470 = arith.mulf %468, %469 : vector<8x128xf32>
    %471 = arith.select %22, %470, %468 : vector<8x128xi1>, vector<8x128xf32>
    %472 = arith.negf %471 : vector<8x128xf32>
    %473 = math.exp %472 : vector<8x128xf32>
    %cst_123 = arith.constant 1.000000e+00 : f32
    %474 = vector.broadcast %cst_123 : f32 to vector<8x128xf32>
    %475 = arith.addf %474, %473 : vector<8x128xf32>
    %476 = arith.divf %474, %475 : vector<8x128xf32>
    %cst_124 = arith.constant 2.000000e+00 : f32
    %477 = vector.broadcast %cst_124 : f32 to vector<8x128xf32>
    %478 = arith.mulf %477, %476 : vector<8x128xf32>
    %cst_125 = arith.constant 1.000000e+00 : f32
    %479 = vector.broadcast %cst_125 : f32 to vector<8x128xf32>
    %480 = arith.subf %478, %479 : vector<8x128xf32>
    %481 = arith.select %22, %480, %476 : vector<8x128xi1>, vector<8x128xf32>
    %482 = vector.extract_strided_slice %481 {offsets = [0, 0], sizes = [8, 32], strides = [1, 1]} : vector<8x128xf32> to vector<8x32xf32>
    %483 = vector.extract_strided_slice %481 {offsets = [0, 32], sizes = [8, 32], strides = [1, 1]} : vector<8x128xf32> to vector<8x32xf32>
    %484 = vector.extract_strided_slice %481 {offsets = [0, 64], sizes = [8, 32], strides = [1, 1]} : vector<8x128xf32> to vector<8x32xf32>
    %485 = vector.extract_strided_slice %481 {offsets = [0, 96], sizes = [8, 32], strides = [1, 1]} : vector<8x128xf32> to vector<8x32xf32>
    %486 = arith.mulf %483, %430 : vector<8x32xf32>
    %487 = arith.mulf %482, %484 : vector<8x32xf32>
    %488 = arith.addf %486, %487 : vector<8x32xf32>
    %489 = math.tanh %488 : vector<8x32xf32>
    %490 = arith.mulf %485, %489 : vector<8x32xf32>
    %c8_i32_126 = arith.constant 8 : i32
    %491 = arith.truncf %490 : vector<8x32xf32> to vector<8x32xbf16>
    %cst_127 = arith.constant dense<0.000000e+00> : vector<8x128xf32>
    %492 = tpu.matmul %491, %15, %cst_127 {dimension_numbers = #tpu.dot_dimension_numbers<[1], [0], [0], [1], [0, 0, 1, 1], [], []>} : vector<8x32xbf16>, vector<32x128xbf16>, vector<8x128xf32> -> vector<8x128xf32>
    %493 = vector.broadcast %16 : vector<1x128xf32> to vector<8x128xf32>
    %494 = arith.addf %492, %493 : vector<8x128xf32>
    %c0_128 = arith.constant 0 : index
    %c0_129 = arith.constant 0 : index
    %495 = vector.load %arg9[%c0_128, %c0_129] : memref<8x128xf32, #tpu.memory_space<vmem>>, vector<8x128xf32>
    tpu.vector_store %arg9[%c0_128, %c0_129], %494 {strides = array<i32>} : memref<8x128xf32, #tpu.memory_space<vmem>>, vector<8x128xf32>,
    return
  }
}

</mosaic_0001>

<bundles_post_ra>
// kernel: lstm_model_forward.1
= control target key start
LH: loop header
LB: loop body
LE: loop exit
PB: predicated region body
PF: predicated region fallthrough
CT: control target
= control target key end

     0   :  { %vm66_vm0 = vcmask 1041408   ;;  %vm53_vm1 = vcmask 31744   ;;  %v2382_v3 = vmov 0.0   ;;  %vm2383_vm2 = vmmov 0   ;;  %s2386_s10 = smov 32   ;;  %s2931_s1 = inlined_call_operand.vmem [shape: bf16[4,128], index: 1, kind: input, shape index: {}]   ;;  %s2932_s0 = inlined_call_operand.vmem [shape: f32[64,4], index: 0, kind: input, shape index: {}]   ;;  %s2933_s2 = inlined_call_operand.vmem [shape: bf16[32,128], index: 2, kind: input, shape index: {}]   ;;  %s2934_s3 = inlined_call_operand.vmem [shape: f32[1,128], index: 3, kind: input, shape index: {}]   ;;  %s2935_s5 = inlined_call_operand.vmem [shape: bf16[32,128], index: 5, kind: input, shape index: {}]   ;;  %s2936_s4 = inlined_call_operand.vmem [shape: bf16[32,128], index: 4, kind: input, shape index: {}]   ;;  %s2937_s6 = inlined_call_operand.vmem [shape: f32[1,128], index: 6, kind: input, shape index: {}]   ;;  %s2938_s7 = inlined_call_operand.vmem [shape: bf16[32,128], index: 7, kind: input, shape index: {}]   ;;  %s2939_s8 = inlined_call_operand.vmem [shape: f32[1,128], index: 8, kind: input, shape index: {}]   ;;  %s2940_s9 = inlined_call_operand.vmem [shape: f32[8,128], index: 9, kind: output, shape index: {}]  }
   0x1   :  { %v45_v0 = vld [vmem:[%s2931_s1] sm:$0x3]  ;;  %v34_v2 = vld [vmem:[%s2932_s0 + $0x8] sm:$0xff]  ;;  %2065 = vmatprep.subr.bf16.mxu1 %v2382_v3  ;;  %2069 = vmatprep.mubr.msk.bf16.mxu1 %vm2383_vm2, %v2382_v3  ;;  %v35_v6 = vld [vmem:[%s2932_s0 + $0x10] sm:$0xff]  ;;  %v2384_v17 = vmov 0   ;;  %v199_v34 = vlaneseq  ;;  %vm218_vm6 = vcmask 261120  }
   0x2   :  { %v33_v1 = vld [vmem:[%s2932_s0] sm:$0xff]  ;;  %2265 = vmatprep.subr.msk.bf16.mxu0 %vm66_vm0, %v45_v0  ;;  %v68_v4 = vsel %vm66_vm0, %v45_v0, 0  ;;  %v36_v7 = vld [vmem:[%s2932_s0 + $0x18] sm:$0xff]  ;;  %v2458_v9 = vld [vmem:[%s2933_s2 + $0x8] sm:$0xff]  }
   0x3   :  { %v41_v5 = vpack.c.bf16 %v34_v2, %v33_v1  ;;  %2056 = vmatpush3.bf16.msra.mxu0 %v68_v4  ;;  %v42_v8 = vpack.c.bf16 %v36_v7, %v35_v6  ;;  %v37_v10 = vld [vmem:[%s2932_s0 + $0x20] sm:$0xff]  ;;  %2066 = vmatpush3.bf16.msra.mxu1 %v2458_v9  ;;  %v38_v12 = vld [vmem:[%s2932_s0 + $0x28] sm:$0xff]  ;;  %v39_v14 = vld [vmem:[%s2932_s0 + $0x30] sm:$0xff]  ;;  %v200_v39 = vand.u32 127, %v199_v34 }
   0x4   :  { %2081 = vmatprep.subr.bf16.mxu0 %v2382_v3  ;;  %v2469_v11 = vld [vmem:[%s2933_s2] sm:$0xff]   ;;  %2067 = vmatprep.subr.bf16.mxu1 %v2382_v3  ;;  %v43_v13 = vpack.c.bf16 %v38_v12, %v37_v10  ;;  %v40_v15 = vld [vmem:[%s2932_s0 + $0x38] sm:$0xff]  ;;  %v2520_v60 = vld [vmem:[%s2935_s5 + $0x8] sm:$0xff]  }
   0x5   :  { %2057 = vmatprep.mubr.msk.bf16.mxu0 %vm53_vm1, %v41_v5  ;;  %v44_v16 = vpack.c.bf16 %v40_v15, %v39_v14  ;;  %v2494_v19 = vld [vmem:[%s2934_s3] ss:$0 sm:$0xff]  ;;  %vm201_vm3 = vcmp.ge.s32.totalorder %v200_v39, 64  ;;  %vm202_vm4 = vcmp.lt.s32.totalorder %v200_v39, 96  ;;  %s2385_s3 = smov 64   ;;  %v2525_v61 = vld [vmem:[%s2936_s4 + $0x8] sm:$0xff]  }
   0x6   :  { %2058 = vmatmul.mubr.msk.bf16.vlgmr.msra.gmra.mxu0 %vm53_vm1, %v42_v8  ;;  %vm2504_vm5 = vmand %vm201_vm3, %vm202_vm4  ;;  %v2531_v62 = vld [vmem:[%s2935_s5] sm:$0xff]  }
   0x7   :  { %2061 = vmatprep.mubr.msk.bf16.mxu0 %vm53_vm1, %v43_v13  ;;  %2068 = vmatpush3.bf16.msra.mxu1 %v2469_v11  ;;  %v2538_v63 = vld [vmem:[%s2936_s4] sm:$0xff]  }
   0x8   :  { %2073 = vmatprep.subr.bf16.mxu1 %v2382_v3  ;;  %2082 = vmatpush3.bf16.msra.mxu0 %v2525_v61  ;;  %v2278_v45 = vld [vmem:[%s2938_s7] sm:$0xff]  }
   0x9   :  { %2083 = vmatprep.subr.bf16.mxu0 %v2382_v3 }
   0xa   :  { %2070 = vmatmul.mubr.bf16.vlgmr.msra.gmra.mxu1 %v2384_v17 }
   0xb   :  { %2077 = vmatprep.mubr.msk.bf16.mxu1 %vm2383_vm2, %v2382_v3  ;;  %2074 = vmatpush3.bf16.msra.mxu1 %v2520_v60 }
   0xc   :  { %2075 = vmatprep.subr.bf16.mxu1 %v2382_v3  ;;  %2084 = vmatpush3.bf16.msra.mxu0 %v2538_v63 }
   0xd   :  { %2097 = vmatprep.subr.bf16.mxu0 %v2382_v3 }
   0xe   :  { %2062 = vmatmul.mubr.msk.bf16.gmra.mxu0 %vm53_vm1, %v44_v16 }
   0xf   :  { %2085 = vmatprep.mubr.msk.bf16.mxu0 %vm2383_vm2, %v2382_v3  ;;  %2076 = vmatpush3.bf16.msra.mxu1 %v2531_v62 }
  0x10   :  { %2089 = vmatprep.subr.bf16.mxu1 %v2382_v3 }
  0x12   :  { %2078 = vmatmul.mubr.bf16.vlgmr.msra.gmra.mxu1 %v2384_v17  ;;  %v2577_v17 = vld [vmem:[%s2937_s6] ss:$0 sm:$0xff] }
  0x13   :  { %2090 = vmatpush3.bf16.msra.mxu1 %v2458_v9  ;;  %2093 = vmatprep.mubr.msk.bf16.mxu1 %vm2383_vm2, %v2382_v3 }
  0x14   :  { %2091 = vmatprep.subr.bf16.mxu1 %v2382_v3 }
  0x17   :  { %2092 = vmatpush3.bf16.msra.mxu1 %v2469_v11 }
  0x18   :  { %2105 = vmatprep.subr.bf16.mxu1 %v2382_v3 }
  0xc6   :  { %v2059_v18 = vpop.f32.mrf.mxu0 }
  0xc7   :  { %v113_v22 = vadd.f32 %v2059_v18, %v2494_v19 }
  0xc8   :  { %v104_v20 = vpop.f32.mrf.mxu0 }
  0xc9   :  { %v105_v26 = vadd.f32 %v2494_v19, %v104_v20 }
  0xca   :  { %v2060_v21 = vpop.f32.mrf.mxu0  ;;  %v256_v25 = vpop.f32.mrf.mxu1 }
  0xcb   :  { %v116_v23 = vadd.f32 %v2060_v21, %v2494_v19 }
  0xcc   :  { %v107_v24 = vpop.f32.mrf.mxu0  ;;  %v2071_v29 = vpop.f32.mrf.mxu1 }
  0xcd   :  { %v1960_v27 = vpack.c.bf16 %v116_v23, %v113_v22  ;;  %v108_v28 = vadd.f32 %v2494_v19, %v107_v24 }
  0xce   :  { %v2500_v30 = vpop.f32.mrf.mxu0  ;;  %v259_v32 = vpop.f32.mrf.mxu1 }
  0xcf   :  { %1972 = vst [vmem:[#allocation2 + $0x8] sm:$0xff] %v1960_v27   ;;  %v1955_v31 = vpack.c.bf16 %v108_v28, %v105_v26  ;;  %v129_v1 = vadd.f32 %v2500_v30, %v2494_v19 }
  0xd0   :  { %v120_v33 = vpop.f32.mrf.mxu0  ;;  %v2072_v35 = vpop.f32.mrf.mxu1 }
  0xd1   :  { %1956 = vst [vmem:[#allocation2] sm:$0xff] %v1955_v31   ;;  %v121_v37 = vadd.f32 %v2494_v19, %v120_v33 }
  0xd2   :  { %v2064_v36 = vpop.f32.mrf.mxu0  ;;  %v338_v8 = vpop.f32.mrf.mxu1 }
  0xd3   :  { %v132_v2 = vadd.f32 %v2064_v36, %v2494_v19 }
  0xd4   :  { %v123_v38 = vpop.f32.mrf.mxu0  ;;  %v2079_v10 = vpop.f32.mrf.mxu1 }
  0xd5   :  { %v124_v40 = vadd.f32 %v2494_v19, %v123_v38  ;;  %v1970_v4 = vpack.c.bf16 %v132_v2, %v129_v1 }
  0xd6   :  { %v341_v12 = vpop.f32.mrf.mxu1 }
  0xd7   :  { %v1965_v41 = vpack.c.bf16 %v124_v40, %v121_v37  ;;  %1974 = vst [vmem:[#allocation2 + $0x18] sm:$0xff] %v1970_v4  }
  0xd8   :  { %v204_v42 = vld [vmem:[#allocation2] sm:$0xf]  ;;  %v2080_v13 = vpop.f32.mrf.mxu1  ;;  %v2571_v15 = vld [vmem:[#allocation2 + $0x4] sm:$0xff]  }
  0xd9   :  { %v205_v43 = vunpack.c.l.bf16 %v204_v42  ;;  %1973 = vst [vmem:[#allocation2 + $0x10] sm:$0xff] %v1965_v41   ;;  %v433_v16 = vunpack.c.l.bf16 %v2571_v15 }
  0xdb   :  { %v262_v44 = vadd.f32 %v256_v25, %v205_v43 }
  0xdd   :  { %v263_v46 = vmul.f32 2.0, %v262_v44 }
  0xdf   :  { %v264_v47 = vsel %vm2504_vm5, %v263_v46, %v262_v44 }
  0xe0   :  { %v1882_v48 = vmul.f32 -1.442695, %v264_v47 }
  0xe2   :  { %2279 = vpow2.f32 %v1882_v48 }
  0xef   :  { %v2280_v49 = vpop.eup %2279 }
  0xf0   :  { %v268_v50 = vadd.f32 1.0, %v2280_v49 }
  0xf2   :  { %2281 = vrcp.f32 %v268_v50 }
  0xff   :  { %v2282_v51 = vpop.eup %2281 }
 0x100   :  { %v271_v52 = vmul.f32 2.0, %v2282_v51 }
 0x102   :  { %v1883_v53 = vadd.f32 -1.0, %v271_v52 }
 0x104   :  { %v273_v54 = vsel %vm2504_vm5, %v1883_v53, %v2282_v51 }
 0x105   :  { %276 = vrot.lane.b32.xlu0 %v273_v54, %s2385_s3  ;;  %v274_v57 = vmul.f32 0.0, %v273_v54 }
 0x177   :  { %v277_v55 = vpop.permute.xlu0 %276 }
 0x178   :  { %v279_v56 = vmul.f32 %v277_v55, %v273_v54 }
 0x17a   :  { %281 = vrot.lane.b32.xlu0 %v279_v56, %s2386_s10 }
 0x1ec   :  { %v282_v58 = vpop.permute.xlu0 %281 }
 0x1ed   :  { %v2514_v59 = vadd.f32 %v282_v58, %v274_v57 }
 0x1ef   :  { %2283 = vtanh.f32 %v2514_v59 }
 0x1fc   :  { %v2284_v0 = vpop.eup %2283 }
 0x1fd   :  { %287 = vrot.lane.b32.xlu1 %v2284_v0, %s2385_s3 }
 0x26f   :  { %v288_v5 = vpop.permute.xlu1 %287 }
 0x270   :  { %v290_v6 = vmul.f32 %v288_v5, %v273_v54 }
 0x272   :  { %v291_v7 = vpack.c.bf16 %v290_v6, %v290_v6 }
 0x274   :  { %345 = vrot.lane.b32.xlu1 %v291_v7, %s2386_s10 }
 0x2e6   :  { %v346_v14 = vpop.permute.xlu1 %345 }
 0x2e7   :  { %2086 = vmatmul.mubr.msk.bf16.vlgmr.msra.gmra.mxu0 %vm218_vm6, %v346_v14  ;;  %2094 = vmatmul.mubr.msk.bf16.vlgmr.msra.gmra.mxu1 %vm218_vm6, %v346_v14 }
 0x2e8   :  { %2106 = vmatpush3.bf16.msra.mxu1 %v2525_v61  ;;  %2098 = vmatpush3.bf16.msra.mxu0 %v2520_v60 }
 0x2e9   :  { %2107 = vmatprep.subr.bf16.mxu1 %v2382_v3  ;;  %2099 = vmatprep.subr.bf16.mxu0 %v2382_v3 }
 0x2ea   :  { %2109 = vmatprep.mubr.msk.bf16.mxu1 %vm2383_vm2, %v2382_v3  ;;  %2101 = vmatprep.mubr.msk.bf16.mxu0 %vm2383_vm2, %v2382_v3 }
 0x2ec   :  { %2108 = vmatpush3.bf16.msra.mxu1 %v2538_v63  ;;  %2100 = vmatpush3.bf16.msra.mxu0 %v2531_v62 }
 0x2ed   :  { %2113 = vmatprep.subr.bf16.mxu0 %v2382_v3  ;;  %2121 = vmatprep.subr.bf16.mxu1 %v2382_v3 }
 0x3a7   :  { %v396_v18 = vpop.f32.mrf.mxu0  ;;  %v468_v19 = vpop.f32.mrf.mxu1 }
 0x3a8   :  { %v397_v20 = vadd.f32 %v396_v18, %v338_v8  ;;  %v474_v21 = vadd.f32 %v468_v19, %v433_v16 }
 0x3a9   :  { %v2087_v22 = vpop.f32.mrf.mxu0  ;;  %v2095_v23 = vpop.f32.mrf.mxu1 }
 0x3aa   :  { %v402_v24 = vadd.f32 %v2577_v17, %v397_v20  ;;  %v475_v25 = vmul.f32 2.0, %v474_v21 }
 0x3ab   :  { %v399_v26 = vpop.f32.mrf.mxu0  ;;  %v471_v27 = vpop.f32.mrf.mxu1 }
 0x3ac   :  { %v403_v28 = vmul.f32 2.0, %v402_v24  ;;  %v476_v29 = vsel %vm2504_vm5, %v475_v25, %v474_v21  ;;  %v628_v25 = vunpack.c.h.bf16 %v2571_v15 }
 0x3ad   :  { %v1892_v30 = vmul.f32 -1.442695, %v476_v29  ;;  %v2088_v31 = vpop.f32.mrf.mxu0  ;;  %v2096_v32 = vpop.f32.mrf.mxu1 }
 0x3ae   :  { %v404_v33 = vsel %vm2504_vm5, %v403_v28, %v402_v24 }
 0x3af   :  { %v1889_v34 = vmul.f32 -1.442695, %v404_v33  ;;  %2285 = vpow2.f32 %v1892_v30 }
 0x3b1   :  { %2287 = vpow2.f32 %v1889_v34 }
 0x3bc   :  { %v2286_v35 = vpop.eup %2285 }
 0x3bd   :  { %v480_v36 = vadd.f32 1.0, %v2286_v35 }
 0x3be   :  { %v2288_v37 = vpop.eup %2287 }
 0x3bf   :  { %v408_v38 = vadd.f32 1.0, %v2288_v37  ;;  %2289 = vrcp.f32 %v480_v36 }
 0x3c1   :  { %2291 = vrcp.f32 %v408_v38 }
 0x3cc   :  { %v2290_v39 = vpop.eup %2289 }
 0x3cd   :  { %v483_v40 = vmul.f32 2.0, %v2290_v39 }
 0x3ce   :  { %v2292_v41 = vpop.eup %2291 }
 0x3cf   :  { %v1893_v42 = vadd.f32 -1.0, %v483_v40  ;;  %v411_v43 = vmul.f32 2.0, %v2292_v41 }
 0x3d1   :  { %v485_v44 = vsel %vm2504_vm5, %v1893_v42, %v2290_v39  ;;  %v1890_v46 = vadd.f32 -1.0, %v411_v43 }
 0x3d2   :  { %488 = vrot.lane.b32.xlu1 %v485_v44, %s2385_s3  ;;  %v486_v52 = vmul.f32 %v485_v44, %v2514_v59 }
 0x3d3   :  { %v413_v47 = vsel %vm2504_vm5, %v1890_v46, %v2292_v41 }
 0x3d4   :  { %416 = vrot.lane.b32.xlu0 %v413_v47, %s2385_s3  ;;  %v414_v55 = vmul.f32 0.0, %v413_v47 }
 0x444   :  { %v489_v48 = vpop.permute.xlu1 %488 }
 0x445   :  { %v491_v49 = vmul.f32 %v489_v48, %v485_v44 }
 0x446   :  { %v417_v50 = vpop.permute.xlu0 %416 }
 0x447   :  { %v419_v51 = vmul.f32 %v417_v50, %v413_v47  ;;  %493 = vrot.lane.b32.xlu1 %v491_v49, %s2386_s10 }
 0x449   :  { %421 = vrot.lane.b32.xlu0 %v419_v51, %s2386_s10 }
 0x4b9   :  { %v494_v53 = vpop.permute.xlu1 %493 }
 0x4ba   :  { %v2593_v54 = vadd.f32 %v494_v53, %v486_v52 }
 0x4bb   :  { %v422_v56 = vpop.permute.xlu0 %421 }
 0x4bc   :  { %2293 = vtanh.f32 %v2593_v54  ;;  %v2596_v57 = vadd.f32 %v422_v56, %v414_v55 }
 0x4be   :  { %2295 = vtanh.f32 %v2596_v57 }
 0x4c9   :  { %v2294_v58 = vpop.eup %2293 }
 0x4ca   :  { %499 = vrot.lane.b32.xlu1 %v2294_v58, %s2385_s3 }
 0x4cb   :  { %v2296_v0 = vpop.eup %2295 }
 0x4cc   :  { %427 = vrot.lane.b32.xlu0 %v2296_v0, %s2385_s3 }
 0x53c   :  { %v500_v1 = vpop.permute.xlu1 %499 }
 0x53d   :  { %v502_v2 = vmul.f32 %v500_v1, %v485_v44 }
 0x53e   :  { %v428_v59 = vpop.permute.xlu0 %427 }
 0x53f   :  { %v503_v4 = vpack.c.bf16 %v502_v2, %v502_v2  ;;  %v430_v5 = vmul.f32 %v428_v59, %v413_v47 }
 0x541   :  { %v504_v6 = vpack.c.bf16 %v430_v5, %v430_v5  ;;  %552 = vrot.lane.b32.xlu1 %v503_v4, %s2386_s10 }
 0x543   :  { %506 = vrot.lane.b32.xlu0 %v504_v6, %s2386_s10 }
 0x5b3   :  { %v553_v7 = vpop.permute.xlu1 %552 }
 0x5b4   :  { %2110 = vmatmul.mubr.msk.bf16.vlgmr.msra.gmra.mxu1 %vm218_vm6, %v553_v7 }
 0x5b5   :  { %v507_v8 = vpop.permute.xlu0 %506  ;;  %2122 = vmatpush3.bf16.msra.mxu1 %v2520_v60  ;;  %2125 = vmatprep.mubr.msk.bf16.mxu1 %vm2383_vm2, %v2382_v3 }
 0x5b6   :  { %2102 = vmatmul.mubr.msk.bf16.vlgmr.msra.gmra.mxu0 %vm218_vm6, %v507_v8  ;;  %2123 = vmatprep.subr.bf16.mxu1 %v2382_v3 }
 0x5b7   :  { %2114 = vmatpush3.bf16.msra.mxu0 %v2458_v9  ;;  %2117 = vmatprep.mubr.msk.bf16.mxu0 %vm2383_vm2, %v2382_v3 }
 0x5b8   :  { %2115 = vmatprep.subr.bf16.mxu0 %v2382_v3 }
 0x5b9   :  { %2124 = vmatpush3.bf16.msra.mxu1 %v2531_v62 }
 0x5ba   :  { %2137 = vmatprep.subr.bf16.mxu1 %v2382_v3 }
 0x5bb   :  { %2116 = vmatpush3.bf16.msra.mxu0 %v2469_v11 }
 0x5bc   :  { %2129 = vmatprep.subr.bf16.mxu0 %v2382_v3 }
 0x5be   :  { %2118 = vmatmul.mubr.msk.bf16.vlgmr.msra.gmra.mxu0 %vm218_vm6, %v553_v7 }
 0x5bf   :  { %2130 = vmatpush3.bf16.msra.mxu0 %v2525_v61  ;;  %2133 = vmatprep.mubr.msk.bf16.mxu0 %vm2383_vm2, %v2382_v3 }
 0x5c0   :  { %2131 = vmatprep.subr.bf16.mxu0 %v2382_v3 }
 0x5c3   :  { %2132 = vmatpush3.bf16.msra.mxu0 %v2538_v63 }
 0x5c4   :  { %2145 = vmatprep.subr.bf16.mxu0 %v2382_v3 }
 0x674   :  { %v591_v10 = vpop.f32.mrf.mxu1 }
 0x676   :  { %v545_v12 = vpop.f32.mrf.mxu0  ;;  %v2111_v13 = vpop.f32.mrf.mxu1 }
 0x677   :  { %v592_v14 = vadd.f32 %v591_v10, %v545_v12  ;;  %v2671_v13 = vld [vmem:[#allocation2 + $0xc] sm:$0xff]  }
 0x678   :  { %v2103_v16 = vpop.f32.mrf.mxu0  ;;  %v594_v18 = vpop.f32.mrf.mxu1 }
 0x679   :  { %v597_v19 = vadd.f32 %v2577_v17, %v592_v14 }
 0x67a   :  { %v548_v20 = vpop.f32.mrf.mxu0  ;;  %v2112_v21 = vpop.f32.mrf.mxu1 }
 0x67b   :  { %v598_v22 = vmul.f32 2.0, %v597_v19 }
 0x67c   :  { %v2104_v23 = vpop.f32.mrf.mxu0 }
 0x67d   :  { %v599_v24 = vsel %vm2504_vm5, %v598_v22, %v597_v19  ;;  %v823_v19 = vunpack.c.l.bf16 %v2671_v13 }
 0x67e   :  { %v1896_v26 = vmul.f32 -1.442695, %v599_v24  ;;  %v663_v27 = vpop.f32.mrf.mxu0 }
 0x67f   :  { %v669_v28 = vadd.f32 %v663_v27, %v628_v25 }
 0x680   :  { %2297 = vpow2.f32 %v1896_v26  ;;  %v2119_v29 = vpop.f32.mrf.mxu0 }
 0x681   :  { %v670_v30 = vmul.f32 2.0, %v669_v28 }
 0x682   :  { %v666_v31 = vpop.f32.mrf.mxu0 }
 0x683   :  { %v671_v32 = vsel %vm2504_vm5, %v670_v30, %v669_v28 }
 0x684   :  { %v1899_v33 = vmul.f32 -1.442695, %v671_v32  ;;  %v2120_v34 = vpop.f32.mrf.mxu0 }
 0x686   :  { %2299 = vpow2.f32 %v1899_v33 }
 0x68d   :  { %v2298_v35 = vpop.eup %2297 }
 0x68e   :  { %v603_v36 = vadd.f32 1.0, %v2298_v35 }
 0x690   :  { %2301 = vrcp.f32 %v603_v36 }
 0x693   :  { %v2300_v37 = vpop.eup %2299 }
 0x694   :  { %v675_v38 = vadd.f32 1.0, %v2300_v37 }
 0x696   :  { %2303 = vrcp.f32 %v675_v38 }
 0x69d   :  { %v2302_v15 = vpop.eup %2301 }
 0x69e   :  { %v606_v39 = vmul.f32 2.0, %v2302_v15 }
 0x6a0   :  { %v1897_v40 = vadd.f32 -1.0, %v606_v39 }
 0x6a2   :  { %v608_v41 = vsel %vm2504_vm5, %v1897_v40, %v2302_v15 }
 0x6a3   :  { %v2304_v42 = vpop.eup %2303  ;;  %611 = vrot.lane.b32.xlu0 %v608_v41, %s2385_s3  ;;  %v609_v51 = vmul.f32 %v608_v41, %v2596_v57 }
 0x6a4   :  { %v678_v43 = vmul.f32 2.0, %v2304_v42 }
 0x6a6   :  { %v1900_v44 = vadd.f32 -1.0, %v678_v43 }
 0x6a8   :  { %v680_v46 = vsel %vm2504_vm5, %v1900_v44, %v2304_v42 }
 0x6a9   :  { %683 = vrot.lane.b32.xlu1 %v680_v46, %s2385_s3  ;;  %v681_v55 = vmul.f32 %v680_v46, %v2593_v54 }
 0x715   :  { %v612_v47 = vpop.permute.xlu0 %611 }
 0x716   :  { %v614_v48 = vmul.f32 %v612_v47, %v608_v41 }
 0x718   :  { %616 = vrot.lane.b32.xlu0 %v614_v48, %s2386_s10 }
 0x71b   :  { %v684_v49 = vpop.permute.xlu1 %683 }
 0x71c   :  { %v686_v50 = vmul.f32 %v684_v49, %v680_v46 }
 0x71e   :  { %688 = vrot.lane.b32.xlu1 %v686_v50, %s2386_s10 }
 0x78a   :  { %v617_v52 = vpop.permute.xlu0 %616 }
 0x78b   :  { %v2639_v53 = vadd.f32 %v617_v52, %v609_v51 }
 0x78d   :  { %2305 = vtanh.f32 %v2639_v53 }
 0x790   :  { %v689_v56 = vpop.permute.xlu1 %688 }
 0x791   :  { %v2643_v58 = vadd.f32 %v689_v56, %v681_v55 }
 0x793   :  { %2307 = vtanh.f32 %v2643_v58 }
 0x79a   :  { %v2306_v0 = vpop.eup %2305 }
 0x79b   :  { %622 = vrot.lane.b32.xlu0 %v2306_v0, %s2385_s3 }
 0x7a0   :  { %v2308_v1 = vpop.eup %2307 }
 0x7a1   :  { %694 = vrot.lane.b32.xlu1 %v2308_v1, %s2385_s3 }
 0x80d   :  { %v623_v2 = vpop.permute.xlu0 %622 }
 0x80e   :  { %v625_v57 = vmul.f32 %v623_v2, %v608_v41 }
 0x810   :  { %v699_v59 = vpack.c.bf16 %v625_v57, %v625_v57 }
 0x812   :  { %701 = vrot.lane.b32.xlu0 %v699_v59, %s2386_s10 }
 0x813   :  { %v695_v4 = vpop.permute.xlu1 %694 }
 0x814   :  { %v697_v5 = vmul.f32 %v695_v4, %v680_v46 }
 0x816   :  { %v698_v6 = vpack.c.bf16 %v697_v5, %v697_v5 }
 0x818   :  { %747 = vrot.lane.b32.xlu1 %v698_v6, %s2386_s10 }
 0x884   :  { %v702_v54 = vpop.permute.xlu0 %701 }
 0x885   :  { %2126 = vmatmul.mubr.msk.bf16.vlgmr.msra.gmra.mxu1 %vm218_vm6, %v702_v54 }
 0x886   :  { %2138 = vmatpush3.bf16.msra.mxu1 %v2458_v9  ;;  %2141 = vmatprep.mubr.msk.bf16.mxu1 %vm2383_vm2, %v2382_v3 }
 0x887   :  { %2139 = vmatprep.subr.bf16.mxu1 %v2382_v3 }
 0x88a   :  { %2140 = vmatpush3.bf16.msra.mxu1 %v2469_v11  ;;  %v748_v7 = vpop.permute.xlu1 %747 }
 0x88b   :  { %2134 = vmatmul.mubr.msk.bf16.vlgmr.msra.gmra.mxu0 %vm218_vm6, %v748_v7  ;;  %2153 = vmatprep.subr.bf16.mxu1 %v2382_v3 }
 0x88c   :  { %2146 = vmatpush3.bf16.msra.mxu0 %v2520_v60  ;;  %2149 = vmatprep.mubr.msk.bf16.mxu0 %vm2383_vm2, %v2382_v3 }
 0x88d   :  { %2142 = vmatmul.mubr.msk.bf16.vlgmr.msra.gmra.mxu1 %vm218_vm6, %v748_v7  ;;  %2147 = vmatprep.subr.bf16.mxu0 %v2382_v3 }
 0x88e   :  { %2154 = vmatpush3.bf16.msra.mxu1 %v2525_v61  ;;  %2157 = vmatprep.mubr.msk.bf16.mxu1 %vm2383_vm2, %v2382_v3 }
 0x88f   :  { %2155 = vmatprep.subr.bf16.mxu1 %v2382_v3 }
 0x890   :  { %2148 = vmatpush3.bf16.msra.mxu0 %v2531_v62 }
 0x891   :  { %2161 = vmatprep.subr.bf16.mxu0 %v2382_v3 }
 0x892   :  { %2156 = vmatpush3.bf16.msra.mxu1 %v2538_v63 }
 0x893   :  { %2169 = vmatprep.subr.bf16.mxu1 %v2382_v3 }
 0x945   :  { %v740_v8 = vpop.f32.mrf.mxu1 }
 0x947   :  { %v2127_v10 = vpop.f32.mrf.mxu1 }
 0x949   :  { %v743_v12 = vpop.f32.mrf.mxu1 }
 0x94b   :  { %v2128_v14 = vpop.f32.mrf.mxu1  ;;  %v786_v16 = vpop.f32.mrf.mxu0 }
 0x94c   :  { %v787_v18 = vadd.f32 %v786_v16, %v740_v8 }
 0x94d   :  { %v2135_v20 = vpop.f32.mrf.mxu0  ;;  %v858_v21 = vpop.f32.mrf.mxu1 }
 0x94e   :  { %v792_v22 = vadd.f32 %v2577_v17, %v787_v18  ;;  %v864_v23 = vadd.f32 %v858_v21, %v823_v19 }
 0x94f   :  { %v789_v24 = vpop.f32.mrf.mxu0  ;;  %v2143_v25 = vpop.f32.mrf.mxu1 }
 0x950   :  { %v793_v26 = vmul.f32 2.0, %v792_v22  ;;  %v865_v27 = vmul.f32 2.0, %v864_v23  ;;  %v1018_v24 = vunpack.c.h.bf16 %v2671_v13 }
 0x951   :  { %v2136_v28 = vpop.f32.mrf.mxu0  ;;  %v861_v29 = vpop.f32.mrf.mxu1 }
 0x952   :  { %v794_v30 = vsel %vm2504_vm5, %v793_v26, %v792_v22  ;;  %v866_v31 = vsel %vm2504_vm5, %v865_v27, %v864_v23 }
 0x953   :  { %v1903_v32 = vmul.f32 -1.442695, %v794_v30  ;;  %v1906_v33 = vmul.f32 -1.442695, %v866_v31  ;;  %v2144_v34 = vpop.f32.mrf.mxu1 }
 0x955   :  { %2309 = vpow2.f32 %v1903_v32 }
 0x956   :  { %2311 = vpow2.f32 %v1906_v33 }
 0x962   :  { %v2310_v35 = vpop.eup %2309 }
 0x963   :  { %v2312_v36 = vpop.eup %2311  ;;  %v798_v37 = vadd.f32 1.0, %v2310_v35 }
 0x964   :  { %v870_v38 = vadd.f32 1.0, %v2312_v36 }
 0x965   :  { %2313 = vrcp.f32 %v798_v37 }
 0x966   :  { %2315 = vrcp.f32 %v870_v38 }
 0x972   :  { %v2314_v15 = vpop.eup %2313 }
 0x973   :  { %v2316_v39 = vpop.eup %2315  ;;  %v801_v40 = vmul.f32 2.0, %v2314_v15 }
 0x974   :  { %v873_v41 = vmul.f32 2.0, %v2316_v39 }
 0x975   :  { %v1904_v42 = vadd.f32 -1.0, %v801_v40 }
 0x976   :  { %v1907_v43 = vadd.f32 -1.0, %v873_v41 }
 0x977   :  { %v803_v44 = vsel %vm2504_vm5, %v1904_v42, %v2314_v15 }
 0x978   :  { %v875_v46 = vsel %vm2504_vm5, %v1907_v43, %v2316_v39  ;;  %806 = vrot.lane.b32.xlu0 %v803_v44, %s2385_s3  ;;  %v804_v51 = vmul.f32 %v803_v44, %v2639_v53 }
 0x979   :  { %878 = vrot.lane.b32.xlu1 %v875_v46, %s2385_s3  ;;  %v876_v52 = vmul.f32 %v875_v46, %v2643_v58 }
 0x9ea   :  { %v807_v47 = vpop.permute.xlu0 %806 }
 0x9eb   :  { %v879_v48 = vpop.permute.xlu1 %878  ;;  %v809_v49 = vmul.f32 %v807_v47, %v803_v44 }
 0x9ec   :  { %v881_v50 = vmul.f32 %v879_v48, %v875_v46 }
 0x9ed   :  { %811 = vrot.lane.b32.xlu0 %v809_v49, %s2386_s10 }
 0x9ee   :  { %883 = vrot.lane.b32.xlu1 %v881_v50, %s2386_s10 }
 0xa5f   :  { %v812_v55 = vpop.permute.xlu0 %811 }
 0xa60   :  { %v884_v56 = vpop.permute.xlu1 %883  ;;  %v2689_v0 = vadd.f32 %v812_v55, %v804_v51 }
 0xa61   :  { %v2691_v1 = vadd.f32 %v884_v56, %v876_v52 }
 0xa62   :  { %2317 = vtanh.f32 %v2689_v0 }
 0xa63   :  { %2319 = vtanh.f32 %v2691_v1 }
 0xa6f   :  { %v2318_v2 = vpop.eup %2317 }
 0xa70   :  { %v2320_v57 = vpop.eup %2319  ;;  %817 = vrot.lane.b32.xlu0 %v2318_v2, %s2385_s3 }
 0xa71   :  { %889 = vrot.lane.b32.xlu1 %v2320_v57, %s2385_s3 }
 0xae2   :  { %v818_v59 = vpop.permute.xlu0 %817 }
 0xae3   :  { %v890_v53 = vpop.permute.xlu1 %889  ;;  %v820_v4 = vmul.f32 %v818_v59, %v803_v44 }
 0xae4   :  { %v892_v58 = vmul.f32 %v890_v53, %v875_v46 }
 0xae5   :  { %v894_v5 = vpack.c.bf16 %v820_v4, %v820_v4 }
 0xae6   :  { %v893_v6 = vpack.c.bf16 %v892_v58, %v892_v58 }
 0xae7   :  { %896 = vrot.lane.b32.xlu0 %v894_v5, %s2386_s10 }
 0xae8   :  { %942 = vrot.lane.b32.xlu1 %v893_v6, %s2386_s10 }
 0xb59   :  { %v897_v54 = vpop.permute.xlu0 %896 }
 0xb5a   :  { %v943_v7 = vpop.permute.xlu1 %942  ;;  %2150 = vmatmul.mubr.msk.bf16.vlgmr.msra.gmra.mxu0 %vm218_vm6, %v897_v54 }
 0xb5b   :  { %2158 = vmatmul.mubr.msk.bf16.vlgmr.msra.gmra.mxu1 %vm218_vm6, %v943_v7  ;;  %2162 = vmatpush3.bf16.msra.mxu0 %v2458_v9 }
 0xb5c   :  { %2163 = vmatprep.subr.bf16.mxu0 %v2382_v3  ;;  %2165 = vmatprep.mubr.msk.bf16.mxu0 %vm2383_vm2, %v2382_v3 }
 0xb5d   :  { %2170 = vmatpush3.bf16.msra.mxu1 %v2520_v60  ;;  %2173 = vmatprep.mubr.msk.bf16.mxu1 %vm2383_vm2, %v2382_v3 }
 0xb5e   :  { %2171 = vmatprep.subr.bf16.mxu1 %v2382_v3 }
 0xb5f   :  { %2164 = vmatpush3.bf16.msra.mxu0 %v2469_v11 }
 0xb60   :  { %2177 = vmatprep.subr.bf16.mxu0 %v2382_v3 }
 0xb61   :  { %2172 = vmatpush3.bf16.msra.mxu1 %v2531_v62 }
 0xb62   :  { %2166 = vmatmul.mubr.msk.bf16.vlgmr.msra.gmra.mxu0 %vm218_vm6, %v943_v7  ;;  %2185 = vmatprep.subr.bf16.mxu1 %v2382_v3 }
 0xb63   :  { %2178 = vmatpush3.bf16.msra.mxu0 %v2525_v61  ;;  %2181 = vmatprep.mubr.msk.bf16.mxu0 %vm2383_vm2, %v2382_v3 }
 0xb64   :  { %2179 = vmatprep.subr.bf16.mxu0 %v2382_v3 }
 0xb67   :  { %2180 = vmatpush3.bf16.msra.mxu0 %v2538_v63 }
 0xb68   :  { %2193 = vmatprep.subr.bf16.mxu0 %v2382_v3 }
 0xc1a   :  { %v935_v8 = vpop.f32.mrf.mxu0 }
 0xc1b   :  { %v981_v10 = vpop.f32.mrf.mxu1 }
 0xc1c   :  { %v982_v12 = vadd.f32 %v981_v10, %v935_v8  ;;  %v2151_v14 = vpop.f32.mrf.mxu0  ;;  %v2767_v8 = vld [vmem:[#allocation2 + $0x14] sm:$0xff]  }
 0xc1d   :  { %v2159_v16 = vpop.f32.mrf.mxu1 }
 0xc1e   :  { %v987_v18 = vadd.f32 %v2577_v17, %v982_v12  ;;  %v938_v19 = vpop.f32.mrf.mxu0 }
 0xc1f   :  { %v984_v20 = vpop.f32.mrf.mxu1 }
 0xc20   :  { %v988_v21 = vmul.f32 2.0, %v987_v18  ;;  %v2152_v22 = vpop.f32.mrf.mxu0 }
 0xc21   :  { %v2160_v23 = vpop.f32.mrf.mxu1 }
 0xc22   :  { %v989_v25 = vsel %vm2504_vm5, %v988_v21, %v987_v18  ;;  %v1053_v26 = vpop.f32.mrf.mxu0  ;;  %v1213_v18 = vunpack.c.l.bf16 %v2767_v8 }
 0xc23   :  { %v1910_v27 = vmul.f32 -1.442695, %v989_v25  ;;  %v1059_v28 = vadd.f32 %v1053_v26, %v1018_v24 }
 0xc24   :  { %v2167_v29 = vpop.f32.mrf.mxu0 }
 0xc25   :  { %2321 = vpow2.f32 %v1910_v27  ;;  %v1060_v30 = vmul.f32 2.0, %v1059_v28 }
 0xc26   :  { %v1056_v31 = vpop.f32.mrf.mxu0 }
 0xc27   :  { %v1061_v32 = vsel %vm2504_vm5, %v1060_v30, %v1059_v28 }
 0xc28   :  { %v1913_v33 = vmul.f32 -1.442695, %v1061_v32  ;;  %v2168_v34 = vpop.f32.mrf.mxu0 }
 0xc2a   :  { %2323 = vpow2.f32 %v1913_v33 }
 0xc32   :  { %v2322_v35 = vpop.eup %2321 }
 0xc33   :  { %v993_v36 = vadd.f32 1.0, %v2322_v35 }
 0xc35   :  { %2325 = vrcp.f32 %v993_v36 }
 0xc37   :  { %v2324_v13 = vpop.eup %2323 }
 0xc38   :  { %v1065_v37 = vadd.f32 1.0, %v2324_v13 }
 0xc3a   :  { %2327 = vrcp.f32 %v1065_v37 }
 0xc42   :  { %v2326_v38 = vpop.eup %2325 }
 0xc43   :  { %v996_v15 = vmul.f32 2.0, %v2326_v38 }
 0xc45   :  { %v1911_v39 = vadd.f32 -1.0, %v996_v15 }
 0xc47   :  { %v2328_v40 = vpop.eup %2327  ;;  %v998_v41 = vsel %vm2504_vm5, %v1911_v39, %v2326_v38 }
 0xc48   :  { %1001 = vrot.lane.b32.xlu0 %v998_v41, %s2385_s3  ;;  %v1068_v42 = vmul.f32 2.0, %v2328_v40  ;;  %v999_v50 = vmul.f32 %v998_v41, %v2689_v0 }
 0xc4a   :  { %v1914_v43 = vadd.f32 -1.0, %v1068_v42 }
 0xc4c   :  { %v1070_v44 = vsel %vm2504_vm5, %v1914_v43, %v2328_v40 }
 0xc4d   :  { %1073 = vrot.lane.b32.xlu1 %v1070_v44, %s2385_s3  ;;  %v1071_v55 = vmul.f32 %v1070_v44, %v2691_v1 }
 0xcba   :  { %v1002_v46 = vpop.permute.xlu0 %1001 }
 0xcbb   :  { %v1004_v47 = vmul.f32 %v1002_v46, %v998_v41 }
 0xcbd   :  { %1006 = vrot.lane.b32.xlu0 %v1004_v47, %s2386_s10 }
 0xcbf   :  { %v1074_v48 = vpop.permute.xlu1 %1073 }
 0xcc0   :  { %v1076_v49 = vmul.f32 %v1074_v48, %v1070_v44 }
 0xcc2   :  { %1078 = vrot.lane.b32.xlu1 %v1076_v49, %s2386_s10 }
 0xd2f   :  { %v1007_v51 = vpop.permute.xlu0 %1006 }
 0xd30   :  { %v2735_v52 = vadd.f32 %v1007_v51, %v999_v50 }
 0xd32   :  { %2329 = vtanh.f32 %v2735_v52 }
 0xd34   :  { %v1079_v56 = vpop.permute.xlu1 %1078 }
 0xd35   :  { %v2739_v2 = vadd.f32 %v1079_v56, %v1071_v55 }
 0xd37   :  { %2331 = vtanh.f32 %v2739_v2 }
 0xd3f   :  { %v2330_v57 = vpop.eup %2329 }
 0xd40   :  { %1012 = vrot.lane.b32.xlu0 %v2330_v57, %s2385_s3 }
 0xd44   :  { %v2332_v59 = vpop.eup %2331 }
 0xd45   :  { %1084 = vrot.lane.b32.xlu1 %v2332_v59, %s2385_s3 }
 0xdb2   :  { %v1013_v53 = vpop.permute.xlu0 %1012 }
 0xdb3   :  { %v1015_v0 = vmul.f32 %v1013_v53, %v998_v41 }
 0xdb5   :  { %v1089_v4 = vpack.c.bf16 %v1015_v0, %v1015_v0 }
 0xdb7   :  { %1091 = vrot.lane.b32.xlu0 %v1089_v4, %s2386_s10  ;;  %v1085_v58 = vpop.permute.xlu1 %1084 }
 0xdb8   :  { %v1087_v5 = vmul.f32 %v1085_v58, %v1070_v44 }
 0xdba   :  { %v1088_v6 = vpack.c.bf16 %v1087_v5, %v1087_v5 }
 0xdbc   :  { %1137 = vrot.lane.b32.xlu1 %v1088_v6, %s2386_s10 }
 0xe29   :  { %v1092_v1 = vpop.permute.xlu0 %1091 }
 0xe2a   :  { %2174 = vmatmul.mubr.msk.bf16.vlgmr.msra.gmra.mxu1 %vm218_vm6, %v1092_v1  ;;  %v2800_v1 = vld [vmem:[%s2933_s2 + $0x8] sm:$0xff]  }
 0xe2b   :  { %2186 = vmatpush3.bf16.msra.mxu1 %v2458_v9  ;;  %2189 = vmatprep.mubr.msk.bf16.mxu1 %vm2383_vm2, %v2382_v3 }
 0xe2c   :  { %2187 = vmatprep.subr.bf16.mxu1 %v2382_v3 }
 0xe2e   :  { %v1138_v54 = vpop.permute.xlu1 %1137 }
 0xe2f   :  { %2188 = vmatpush3.bf16.msra.mxu1 %v2469_v11  ;;  %2182 = vmatmul.mubr.msk.bf16.vlgmr.msra.gmra.mxu0 %vm218_vm6, %v1138_v54 }
 0xe30   :  { %2201 = vmatprep.subr.bf16.mxu1 %v2382_v3  ;;  %2194 = vmatpush3.bf16.msra.mxu0 %v2520_v60 }
 0xe31   :  { %2195 = vmatprep.subr.bf16.mxu0 %v2382_v3  ;;  %2197 = vmatprep.mubr.msk.bf16.mxu0 %vm2383_vm2, %v2382_v3 }
 0xe32   :  { %2190 = vmatmul.mubr.msk.bf16.vlgmr.msra.gmra.mxu1 %vm218_vm6, %v1138_v54  ;;  %v2813_v54 = vld [vmem:[%s2933_s2] sm:$0xff]  }
 0xe33   :  { %2202 = vmatpush3.bf16.msra.mxu1 %v2525_v61  ;;  %2205 = vmatprep.mubr.msk.bf16.mxu1 %vm2383_vm2, %v2382_v3 }
 0xe34   :  { %2203 = vmatprep.subr.bf16.mxu1 %v2382_v3  ;;  %2196 = vmatpush3.bf16.msra.mxu0 %v2531_v62 }
 0xe35   :  { %2209 = vmatprep.subr.bf16.mxu0 %v2382_v3 }
 0xe37   :  { %2204 = vmatpush3.bf16.msra.mxu1 %v2538_v63 }
 0xe38   :  { %2217 = vmatprep.subr.bf16.mxu1 %v2382_v3 }
 0xeea   :  { %v1130_v9 = vpop.f32.mrf.mxu1 }
 0xeec   :  { %v2175_v11 = vpop.f32.mrf.mxu1 }
 0xeee   :  { %v1133_v7 = vpop.f32.mrf.mxu1 }
 0xeef   :  { %v1176_v10 = vpop.f32.mrf.mxu0 }
 0xef0   :  { %v2176_v12 = vpop.f32.mrf.mxu1  ;;  %v1177_v14 = vadd.f32 %v1176_v10, %v1130_v9 }
 0xef1   :  { %v2183_v16 = vpop.f32.mrf.mxu0 }
 0xef2   :  { %v1182_v19 = vadd.f32 %v2577_v17, %v1177_v14  ;;  %v1248_v20 = vpop.f32.mrf.mxu1 }
 0xef3   :  { %v1254_v21 = vadd.f32 %v1248_v20, %v1213_v18  ;;  %v1179_v22 = vpop.f32.mrf.mxu0 }
 0xef4   :  { %v1183_v23 = vmul.f32 2.0, %v1182_v19  ;;  %v2191_v24 = vpop.f32.mrf.mxu1 }
 0xef5   :  { %v1255_v25 = vmul.f32 2.0, %v1254_v21  ;;  %v2184_v26 = vpop.f32.mrf.mxu0 }
 0xef6   :  { %v1184_v27 = vsel %vm2504_vm5, %v1183_v23, %v1182_v19  ;;  %v1251_v28 = vpop.f32.mrf.mxu1  ;;  %v1408_v19 = vunpack.c.h.bf16 %v2767_v8 }
 0xef7   :  { %v1917_v29 = vmul.f32 -1.442695, %v1184_v27  ;;  %v1256_v30 = vsel %vm2504_vm5, %v1255_v25, %v1254_v21 }
 0xef8   :  { %v1920_v31 = vmul.f32 -1.442695, %v1256_v30  ;;  %v2192_v32 = vpop.f32.mrf.mxu1 }
 0xef9   :  { %2333 = vpow2.f32 %v1917_v29 }
 0xefa   :  { %2335 = vpow2.f32 %v1920_v31 }
 0xf06   :  { %v2334_v33 = vpop.eup %2333 }
 0xf07   :  { %v2336_v34 = vpop.eup %2335  ;;  %v1188_v35 = vadd.f32 1.0, %v2334_v33 }
 0xf08   :  { %v1260_v36 = vadd.f32 1.0, %v2336_v34 }
 0xf09   :  { %2337 = vrcp.f32 %v1188_v35 }
 0xf0a   :  { %2339 = vrcp.f32 %v1260_v36 }
 0xf16   :  { %v2338_v13 = vpop.eup %2337 }
 0xf17   :  { %v2340_v37 = vpop.eup %2339  ;;  %v1191_v38 = vmul.f32 2.0, %v2338_v13 }
 0xf18   :  { %v1263_v15 = vmul.f32 2.0, %v2340_v37 }
 0xf19   :  { %v1918_v39 = vadd.f32 -1.0, %v1191_v38 }
 0xf1a   :  { %v1921_v40 = vadd.f32 -1.0, %v1263_v15 }
 0xf1b   :  { %v1193_v41 = vsel %vm2504_vm5, %v1918_v39, %v2338_v13 }
 0xf1c   :  { %v1265_v42 = vsel %vm2504_vm5, %v1921_v40, %v2340_v37  ;;  %1196 = vrot.lane.b32.xlu0 %v1193_v41, %s2385_s3  ;;  %v1194_v48 = vmul.f32 %v1193_v41, %v2735_v52 }
 0xf1d   :  { %1268 = vrot.lane.b32.xlu1 %v1265_v42, %s2385_s3  ;;  %v1266_v49 = vmul.f32 %v1265_v42, %v2739_v2 }
 0xf8e   :  { %v1197_v43 = vpop.permute.xlu0 %1196 }
 0xf8f   :  { %v1269_v44 = vpop.permute.xlu1 %1268  ;;  %v1199_v46 = vmul.f32 %v1197_v43, %v1193_v41 }
 0xf90   :  { %v1271_v47 = vmul.f32 %v1269_v44, %v1265_v42 }
 0xf91   :  { %1201 = vrot.lane.b32.xlu0 %v1199_v46, %s2386_s10 }
 0xf92   :  { %1273 = vrot.lane.b32.xlu1 %v1271_v47, %s2386_s10 }
0x1003   :  { %v1202_v50 = vpop.permute.xlu0 %1201 }
0x1004   :  { %v1274_v51 = vpop.permute.xlu1 %1273  ;;  %v2785_v55 = vadd.f32 %v1202_v50, %v1194_v48 }
0x1005   :  { %v2787_v56 = vadd.f32 %v1274_v51, %v1266_v49 }
0x1006   :  { %2341 = vtanh.f32 %v2785_v55 }
0x1007   :  { %2343 = vtanh.f32 %v2787_v56 }
0x1013   :  { %v2342_v57 = vpop.eup %2341 }
0x1014   :  { %v2344_v59 = vpop.eup %2343  ;;  %1207 = vrot.lane.b32.xlu0 %v2342_v57, %s2385_s3 }
0x1015   :  { %1279 = vrot.lane.b32.xlu1 %v2344_v59, %s2385_s3 }
0x1086   :  { %v1208_v53 = vpop.permute.xlu0 %1207 }
0x1087   :  { %v1280_v52 = vpop.permute.xlu1 %1279  ;;  %v1210_v0 = vmul.f32 %v1208_v53, %v1193_v41 }
0x1088   :  { %v1282_v2 = vmul.f32 %v1280_v52, %v1265_v42 }
0x1089   :  { %v1284_v4 = vpack.c.bf16 %v1210_v0, %v1210_v0  ;;  %v2377_v0 = vld [vmem:[%s2935_s5 + $0x8] sm:$0xff]  }
0x108a   :  { %v1283_v58 = vpack.c.bf16 %v1282_v2, %v1282_v2  ;;  %v2378_v2 = vld [vmem:[%s2936_s4 + $0x8] sm:$0xff]  }
0x108b   :  { %1286 = vrot.lane.b32.xlu0 %v1284_v4, %s2386_s10  ;;  %v2379_v4 = vld [vmem:[%s2935_s5] sm:$0xff]  }
0x108c   :  { %1332 = vrot.lane.b32.xlu1 %v1283_v58, %s2386_s10  ;;  %v2380_v58 = vld [vmem:[%s2936_s4] sm:$0xff]  }
0x10fd   :  { %v1287_v5 = vpop.permute.xlu0 %1286 }
0x10fe   :  { %v1333_v6 = vpop.permute.xlu1 %1332  ;;  %2198 = vmatmul.mubr.msk.bf16.vlgmr.msra.gmra.mxu0 %vm218_vm6, %v1287_v5 }
0x10ff   :  { %2206 = vmatmul.mubr.msk.bf16.vlgmr.msra.gmra.mxu1 %vm218_vm6, %v1333_v6  ;;  %2210 = vmatpush3.bf16.msra.mxu0 %v2800_v1 }
0x1100   :  { %2211 = vmatprep.subr.bf16.mxu0 %v2382_v3  ;;  %2213 = vmatprep.mubr.msk.bf16.mxu0 %vm2383_vm2, %v2382_v3 }
0x1101   :  { %2218 = vmatpush3.bf16.msra.mxu1 %v2520_v60  ;;  %2221 = vmatprep.mubr.msk.bf16.mxu1 %vm2383_vm2, %v2382_v3 }
0x1102   :  { %2219 = vmatprep.subr.bf16.mxu1 %v2382_v3 }
0x1103   :  { %2212 = vmatpush3.bf16.msra.mxu0 %v2813_v54 }
0x1104   :  { %2225 = vmatprep.subr.bf16.mxu0 %v2382_v3 }
0x1105   :  { %2220 = vmatpush3.bf16.msra.mxu1 %v2531_v62 }
0x1106   :  { %2214 = vmatmul.mubr.msk.bf16.vlgmr.msra.gmra.mxu0 %vm218_vm6, %v1333_v6  ;;  %2233 = vmatprep.subr.bf16.mxu1 %v2382_v3 }
0x1107   :  { %2226 = vmatpush3.bf16.msra.mxu0 %v2525_v61  ;;  %2229 = vmatprep.mubr.msk.bf16.mxu0 %vm2383_vm2, %v2382_v3 }
0x1108   :  { %2227 = vmatprep.subr.bf16.mxu0 %v2382_v3 }
0x110b   :  { %2228 = vmatpush3.bf16.msra.mxu0 %v2538_v63 }
0x110c   :  { %2241 = vmatprep.subr.bf16.mxu0 %v2382_v3 }
0x11be   :  { %v1325_v60 = vpop.f32.mrf.mxu0 }
0x11bf   :  { %v1371_v9 = vpop.f32.mrf.mxu1 }
0x11c0   :  { %v1372_v11 = vadd.f32 %v1371_v9, %v1325_v60  ;;  %v2199_v7 = vpop.f32.mrf.mxu0 }
0x11c1   :  { %v2207_v62 = vpop.f32.mrf.mxu1 }
0x11c2   :  { %v1377_v10 = vadd.f32 %v2577_v17, %v1372_v11  ;;  %v1328_v12 = vpop.f32.mrf.mxu0 }
0x11c3   :  { %v1374_v14 = vpop.f32.mrf.mxu1 }
0x11c4   :  { %v1378_v16 = vmul.f32 2.0, %v1377_v10  ;;  %v2200_v61 = vpop.f32.mrf.mxu0 }
0x11c5   :  { %v2208_v18 = vpop.f32.mrf.mxu1 }
0x11c6   :  { %v1379_v20 = vsel %vm2504_vm5, %v1378_v16, %v1377_v10  ;;  %v1443_v63 = vpop.f32.mrf.mxu0  ;;  %v2883_v10 = vld [vmem:[%s2937_s6] ss:$0 sm:$0xff] }
0x11c7   :  { %v1924_v21 = vmul.f32 -1.442695, %v1379_v20  ;;  %v1449_v22 = vadd.f32 %v1443_v63, %v1408_v19 }
0x11c8   :  { %v2215_v23 = vpop.f32.mrf.mxu0 }
0x11c9   :  { %2345 = vpow2.f32 %v1924_v21  ;;  %v1450_v24 = vmul.f32 2.0, %v1449_v22 }
0x11ca   :  { %v1446_v25 = vpop.f32.mrf.mxu0 }
0x11cb   :  { %v1451_v17 = vsel %vm2504_vm5, %v1450_v24, %v1449_v22 }
0x11cc   :  { %v1927_v26 = vmul.f32 -1.442695, %v1451_v17  ;;  %v2216_v27 = vpop.f32.mrf.mxu0 }
0x11ce   :  { %2347 = vpow2.f32 %v1927_v26 }
0x11d6   :  { %v2346_v28 = vpop.eup %2345 }
0x11d7   :  { %v1383_v29 = vadd.f32 1.0, %v2346_v28 }
0x11d9   :  { %2349 = vrcp.f32 %v1383_v29 }
0x11db   :  { %v2348_v8 = vpop.eup %2347 }
0x11dc   :  { %v1455_v30 = vadd.f32 1.0, %v2348_v8 }
0x11de   :  { %2351 = vrcp.f32 %v1455_v30 }
0x11e6   :  { %v2350_v31 = vpop.eup %2349 }
0x11e7   :  { %v1386_v32 = vmul.f32 2.0, %v2350_v31 }
0x11e9   :  { %v1925_v33 = vadd.f32 -1.0, %v1386_v32 }
0x11eb   :  { %v2352_v34 = vpop.eup %2351  ;;  %v1388_v35 = vsel %vm2504_vm5, %v1925_v33, %v2350_v31 }
0x11ec   :  { %1391 = vrot.lane.b32.xlu0 %v1388_v35, %s2385_s3  ;;  %v1458_v36 = vmul.f32 2.0, %v2352_v34  ;;  %v1389_v41 = vmul.f32 %v1388_v35, %v2785_v55 }
0x11ee   :  { %v1928_v13 = vadd.f32 -1.0, %v1458_v36 }
0x11f0   :  { %v1460_v37 = vsel %vm2504_vm5, %v1928_v13, %v2352_v34 }
0x11f1   :  { %1463 = vrot.lane.b32.xlu1 %v1460_v37, %s2385_s3  ;;  %v1461_v44 = vmul.f32 %v1460_v37, %v2787_v56 }
0x125e   :  { %v1392_v38 = vpop.permute.xlu0 %1391 }
0x125f   :  { %v1394_v15 = vmul.f32 %v1392_v38, %v1388_v35 }
0x1261   :  { %1396 = vrot.lane.b32.xlu0 %v1394_v15, %s2386_s10 }
0x1263   :  { %v1464_v39 = vpop.permute.xlu1 %1463 }
0x1264   :  { %v1466_v40 = vmul.f32 %v1464_v39, %v1460_v37 }
0x1266   :  { %1468 = vrot.lane.b32.xlu1 %v1466_v40, %s2386_s10 }
0x12d3   :  { %v1397_v42 = vpop.permute.xlu0 %1396 }
0x12d4   :  { %v2841_v43 = vadd.f32 %v1397_v42, %v1389_v41 }
0x12d6   :  { %2353 = vtanh.f32 %v2841_v43 }
0x12d8   :  { %v1469_v46 = vpop.permute.xlu1 %1468 }
0x12d9   :  { %v2845_v47 = vadd.f32 %v1469_v46, %v1461_v44 }
0x12db   :  { %2355 = vtanh.f32 %v2845_v47 }
0x12e3   :  { %v2354_v48 = vpop.eup %2353 }
0x12e4   :  { %1402 = vrot.lane.b32.xlu0 %v2354_v48, %s2385_s3 }
0x12e8   :  { %v2356_v49 = vpop.eup %2355 }
0x12e9   :  { %1474 = vrot.lane.b32.xlu1 %v2356_v49, %s2385_s3 }
0x1356   :  { %v1403_v50 = vpop.permute.xlu0 %1402 }
0x1357   :  { %v1405_v51 = vmul.f32 %v1403_v50, %v1388_v35 }
0x1359   :  { %v1479_v55 = vpack.c.bf16 %v1405_v51, %v1405_v51 }
0x135b   :  { %1481 = vrot.lane.b32.xlu0 %v1479_v55, %s2386_s10  ;;  %v1475_v57 = vpop.permute.xlu1 %1474 }
0x135c   :  { %v1477_v59 = vmul.f32 %v1475_v57, %v1460_v37 }
0x135e   :  { %v1478_v53 = vpack.c.bf16 %v1477_v59, %v1477_v59 }
0x1360   :  { %1527 = vrot.lane.b32.xlu1 %v1478_v53, %s2386_s10 }
0x13cd   :  { %v1482_v56 = vpop.permute.xlu0 %1481 }
0x13ce   :  { %2222 = vmatmul.mubr.msk.bf16.vlgmr.msra.gmra.mxu1 %vm218_vm6, %v1482_v56 }
0x13cf   :  { %2234 = vmatpush3.bf16.msra.mxu1 %v2800_v1  ;;  %2237 = vmatprep.mubr.msk.bf16.mxu1 %vm2383_vm2, %v2382_v3 }
0x13d0   :  { %2235 = vmatprep.subr.bf16.mxu1 %v2382_v3 }
0x13d2   :  { %v1528_v52 = vpop.permute.xlu1 %1527 }
0x13d3   :  { %2236 = vmatpush3.bf16.msra.mxu1 %v2813_v54  ;;  %2230 = vmatmul.mubr.msk.bf16.vlgmr.msra.gmra.mxu0 %vm218_vm6, %v1528_v52  ;;  %v1602_v54 = vld [vmem:[#allocation2 + $0x1c] sm:$0xf] }
0x13d4   :  { %2249 = vmatprep.subr.bf16.mxu1 %v2382_v3  ;;  %2242 = vmatpush3.bf16.msra.mxu0 %v2377_v0  ;;  %v1603_v62 = vunpack.c.l.bf16 %v1602_v54 }
0x13d5   :  { %2243 = vmatprep.subr.bf16.mxu0 %v2382_v3  ;;  %2245 = vmatprep.mubr.msk.bf16.mxu0 %vm2383_vm2, %v2382_v3 }
0x13d6   :  { %2238 = vmatmul.mubr.msk.bf16.vlgmr.msra.gmra.mxu1 %vm218_vm6, %v1528_v52 }
0x13d7   :  { %2250 = vmatpush3.bf16.msra.mxu1 %v2378_v2  ;;  %2253 = vmatprep.mubr.msk.bf16.mxu1 %vm2383_vm2, %v2382_v3 }
0x13d8   :  { %2251 = vmatprep.subr.bf16.mxu1 %v2382_v3  ;;  %2244 = vmatpush3.bf16.msra.mxu0 %v2379_v4 }
0x13d9   :  { %2257 = vmatprep.subr.bf16.mxu0 %v2382_v3 }
0x13db   :  { %2252 = vmatpush3.bf16.msra.mxu1 %v2380_v58 }
0x148e   :  { %v1520_v5 = vpop.f32.mrf.mxu1 }
0x1490   :  { %v2223_v6 = vpop.f32.mrf.mxu1 }
0x1492   :  { %v1523_v1 = vpop.f32.mrf.mxu1 }
0x1493   :  { %v1566_v60 = vpop.f32.mrf.mxu0 }
0x1494   :  { %v2224_v9 = vpop.f32.mrf.mxu1  ;;  %v1567_v11 = vadd.f32 %v1566_v60, %v1520_v5 }
0x1495   :  { %v2231_v7 = vpop.f32.mrf.mxu0 }
0x1496   :  { %v1572_v12 = vadd.f32 %v2883_v10, %v1567_v11  ;;  %v1638_v14 = vpop.f32.mrf.mxu1 }
0x1497   :  { %v1644_v16 = vadd.f32 %v1638_v14, %v1603_v62  ;;  %v1569_v61 = vpop.f32.mrf.mxu0 }
0x1498   :  { %v1573_v18 = vmul.f32 2.0, %v1572_v12  ;;  %v2239_v19 = vpop.f32.mrf.mxu1 }
0x1499   :  { %v1645_v20 = vmul.f32 2.0, %v1644_v16  ;;  %v2232_v63 = vpop.f32.mrf.mxu0 }
0x149a   :  { %v1574_v21 = vsel %vm2504_vm5, %v1573_v18, %v1572_v12  ;;  %v1641_v22 = vpop.f32.mrf.mxu1 }
0x149b   :  { %v1931_v23 = vmul.f32 -1.442695, %v1574_v21  ;;  %v1646_v24 = vsel %vm2504_vm5, %v1645_v20, %v1644_v16  ;;  %v2277_v21 = vld [vmem:[%s2938_s7 + $0x8] sm:$0xff]  }
0x149c   :  { %v1934_v25 = vmul.f32 -1.442695, %v1646_v24  ;;  %v2240_v17 = vpop.f32.mrf.mxu1 }
0x149d   :  { %2357 = vpow2.f32 %v1931_v23 }
0x149e   :  { %2359 = vpow2.f32 %v1934_v25 }
0x14aa   :  { %v2358_v26 = vpop.eup %2357 }
0x14ab   :  { %v2360_v27 = vpop.eup %2359  ;;  %v1578_v28 = vadd.f32 1.0, %v2358_v26  ;;  %v1940_v26 = vld [vmem:[%s2939_s8] ss:$0 sm:$0xff] }
0x14ac   :  { %v1650_v29 = vadd.f32 1.0, %v2360_v27 }
0x14ad   :  { %2361 = vrcp.f32 %v1578_v28 }
0x14ae   :  { %2363 = vrcp.f32 %v1650_v29 }
0x14ba   :  { %v2362_v8 = vpop.eup %2361 }
0x14bb   :  { %v2364_v30 = vpop.eup %2363  ;;  %v1581_v31 = vmul.f32 2.0, %v2362_v8 }
0x14bc   :  { %v1653_v32 = vmul.f32 2.0, %v2364_v30 }
0x14bd   :  { %v1932_v33 = vadd.f32 -1.0, %v1581_v31 }
0x14be   :  { %v1935_v34 = vadd.f32 -1.0, %v1653_v32 }
0x14bf   :  { %v1583_v35 = vsel %vm2504_vm5, %v1932_v33, %v2362_v8 }
0x14c0   :  { %v1655_v36 = vsel %vm2504_vm5, %v1935_v34, %v2364_v30  ;;  %1586 = vrot.lane.b32.xlu0 %v1583_v35, %s2385_s3  ;;  %v1584_v39 = vmul.f32 %v1583_v35, %v2841_v43 }
0x14c1   :  { %1658 = vrot.lane.b32.xlu1 %v1655_v36, %s2385_s3  ;;  %v1656_v40 = vmul.f32 %v1655_v36, %v2845_v47 }
0x1532   :  { %v1587_v13 = vpop.permute.xlu0 %1586 }
0x1533   :  { %v1659_v37 = vpop.permute.xlu1 %1658  ;;  %v1589_v38 = vmul.f32 %v1587_v13, %v1583_v35 }
0x1534   :  { %v1661_v15 = vmul.f32 %v1659_v37, %v1655_v36 }
0x1535   :  { %1591 = vrot.lane.b32.xlu0 %v1589_v38, %s2386_s10 }
0x1536   :  { %1663 = vrot.lane.b32.xlu1 %v1661_v15, %s2386_s10 }
0x15a7   :  { %v1592_v41 = vpop.permute.xlu0 %1591 }
0x15a8   :  { %v1664_v42 = vpop.permute.xlu1 %1663  ;;  %v1594_v44 = vadd.f32 %v1592_v41, %v1584_v39 }
0x15a9   :  { %v1666_v46 = vadd.f32 %v1664_v42, %v1656_v40 }
0x15aa   :  { %2365 = vtanh.f32 %v1594_v44 }
0x15ab   :  { %2367 = vtanh.f32 %v1666_v46 }
0x15b7   :  { %v2366_v48 = vpop.eup %2365 }
0x15b8   :  { %v2368_v49 = vpop.eup %2367  ;;  %1597 = vrot.lane.b32.xlu0 %v2366_v48, %s2385_s3 }
0x15b9   :  { %1669 = vrot.lane.b32.xlu1 %v2368_v49, %s2385_s3 }
0x162a   :  { %v1598_v50 = vpop.permute.xlu0 %1597 }
0x162b   :  { %v1670_v51 = vpop.permute.xlu1 %1669  ;;  %v1600_v55 = vmul.f32 %v1598_v50, %v1583_v35 }
0x162c   :  { %v1672_v57 = vmul.f32 %v1670_v51, %v1655_v36 }
0x162d   :  { %v1674_v59 = vpack.c.bf16 %v1600_v55, %v1600_v55 }
0x162e   :  { %v1673_v43 = vpack.c.bf16 %v1672_v57, %v1672_v57 }
0x162f   :  { %1676 = vrot.lane.b32.xlu0 %v1674_v59, %s2386_s10 }
0x1630   :  { %1722 = vrot.lane.b32.xlu1 %v1673_v43, %s2386_s10 }
0x16a1   :  { %v1677_v47 = vpop.permute.xlu0 %1676 }
0x16a2   :  { %v1723_v53 = vpop.permute.xlu1 %1722  ;;  %2246 = vmatmul.mubr.msk.bf16.vlgmr.msra.gmra.mxu0 %vm218_vm6, %v1677_v47 }
0x16a3   :  { %2254 = vmatmul.mubr.msk.bf16.vlgmr.msra.gmra.mxu1 %vm218_vm6, %v1723_v53  ;;  %2261 = vmatprep.mubr.msk.bf16.mxu0 %vm2383_vm2, %v2382_v3 }
0x16a4   :  { %2258 = vmatpush3.bf16.msra.mxu0 %v2277_v21 }
0x16a5   :  { %2259 = vmatprep.subr.bf16.mxu0 %v2382_v3 }
0x16a8   :  { %2260 = vmatpush3.bf16.msra.mxu0 %v2278_v45 }
0x1762   :  { %v1715_v56 = vpop.f32.mrf.mxu0 }
0x1763   :  { %v1761_v52 = vpop.f32.mrf.mxu1 }
0x1764   :  { %v1762_v0 = vadd.f32 %v1761_v52, %v1715_v56  ;;  %v2247_v2 = vpop.f32.mrf.mxu0 }
0x1765   :  { %v2255_v4 = vpop.f32.mrf.mxu1 }
0x1766   :  { %v1767_v58 = vadd.f32 %v2883_v10, %v1762_v0  ;;  %v1718_v5 = vpop.f32.mrf.mxu0 }
0x1767   :  { %v1764_v6 = vpop.f32.mrf.mxu1 }
0x1768   :  { %v1768_v1 = vmul.f32 2.0, %v1767_v58  ;;  %v2248_v54 = vpop.f32.mrf.mxu0 }
0x1769   :  { %v2256_v60 = vpop.f32.mrf.mxu1 }
0x176a   :  { %v1769_v9 = vsel %vm2504_vm5, %v1768_v1, %v1767_v58 }
0x176b   :  { %v1938_v11 = vmul.f32 -1.442695, %v1769_v9 }
0x176d   :  { %2369 = vpow2.f32 %v1938_v11 }
0x177a   :  { %v2370_v7 = vpop.eup %2369 }
0x177b   :  { %v1773_v62 = vadd.f32 1.0, %v2370_v7 }
0x177d   :  { %2371 = vrcp.f32 %v1773_v62 }
0x178a   :  { %v2372_v12 = vpop.eup %2371 }
0x178b   :  { %v1776_v14 = vmul.f32 2.0, %v2372_v12 }
0x178d   :  { %v1939_v16 = vadd.f32 -1.0, %v1776_v14 }
0x178f   :  { %v1778_v61 = vsel %vm2504_vm5, %v1939_v16, %v2372_v12 }
0x1790   :  { %1781 = vrot.lane.b32.xlu0 %v1778_v61, %s2385_s3  ;;  %v1779_v19 = vmul.f32 %v1778_v61, %v1594_v44 }
0x1802   :  { %v1782_v10 = vpop.permute.xlu0 %1781 }
0x1803   :  { %v1784_v18 = vmul.f32 %v1782_v10, %v1778_v61 }
0x1805   :  { %1786 = vrot.lane.b32.xlu1 %v1784_v18, %s2386_s10 }
0x1877   :  { %v1787_v20 = vpop.permute.xlu1 %1786 }
0x1878   :  { %v1789_v63 = vadd.f32 %v1787_v20, %v1779_v19 }
0x187a   :  { %2373 = vtanh.f32 %v1789_v63 }
0x1887   :  { %v2374_v22 = vpop.eup %2373 }
0x1888   :  { %1792 = vrot.lane.b32.xlu0 %v2374_v22, %s2385_s3 }
0x18fa   :  { %v1793_v23 = vpop.permute.xlu0 %1792 }
0x18fb   :  { %v1795_v24 = vmul.f32 %v1793_v23, %v1778_v61 }
0x18fd   :  { %v1796_v25 = vpack.c.bf16 %v1795_v24, %v1795_v24 }
0x18ff   :  { %1804 = vrot.lane.b32.xlu1 %v1796_v25, %s2386_s10 }
0x1971   :  { %v1805_v17 = vpop.permute.xlu1 %1804 }
0x1972   :  { %2262 = vmatmul.mubr.msk.bf16.vlgmr.msra.gmra.mxu0 %vm218_vm6, %v1805_v17 }
0x1a32   :  { %v1855_v27 = vpop.f32.mrf.mxu0 }
0x1a33   :  { %v1856_v28 = vadd.f32 %v1940_v26, %v1855_v27 }
0x1a34   :  { %v2263_v29 = vpop.f32.mrf.mxu0 }
0x1a35   :  { %1861 = vst [vmem:[%s2940_s9] sm:$0xff] %v1856_v28 }
0x1a36   :  { %v1858_v3 = vpop.f32.mrf.mxu0 }
0x1a38   :  { %v2264_v8 = vpop.f32.mrf.mxu0 }

</bundles_post_ra>
